<compile_context>
chip_gen: v7x
topology: tpu7x:2x2x1
jax: 0.10.0
libtpu: 0.0.40
codegen_flags: <defaults>
</compile_context>

<pallas_src>
import functools

import numpy as np

import jax
import jax.numpy as jnp
from jax.experimental import pallas as pl
from jax.experimental.pallas import tpu as pltpu


def _round_up(x, m):
    return ((x + m - 1) // m) * m


# ----------------------------------------------------------------------------
# Pallas kernel: fused LayerNorm + Gaussian-RBF basis + spline/base matmuls.
# Tile layout: inputs (L, T), output (C_out, T) with T (pixels) on lanes.
# ----------------------------------------------------------------------------
def _fastkan_kernel(x_ref, gamma_ref, beta_ref, wsp_ref, wb_ref, bb_ref, o_ref,
                    *, grid_pts, inv_denom, eps, num_grids, mm_dtype):
    x = x_ref[0]                                           # (L, T) float32

    # LayerNorm over the patch dimension L (sublane axis), biased variance.
    mean = jnp.mean(x, axis=0, keepdims=True)              # (1, T)
    cen = x - mean
    var = jnp.mean(cen * cen, axis=0, keepdims=True)       # (1, T)
    xn = cen * jax.lax.rsqrt(var + eps)
    xn = xn * gamma_ref[...] + beta_ref[...]               # (L, 1) broadcasts

    # Base update: silu(x) @ W_base^T, computed as W_base @ silu on the
    # (L, T) slab.  sigmoid written via tanh -> a single EUP op.
    silu = x * (0.5 * (jnp.tanh(0.5 * x) + 1.0))
    acc = jnp.dot(wb_ref[...], silu.astype(mm_dtype),
                  preferred_element_type=jnp.float32)      # (C_out, T)
    acc = acc + bb_ref[...]                                # (C_out, 1) bcast

    # Spline path: G Gaussian bases, one (O,L)x(L,T) dot each, shared f32 acc.
    for j in range(num_grids):
        d = (xn - grid_pts[j]) * inv_denom
        basis = jnp.exp(-(d * d))                          # (L, T)
        acc = acc + jnp.dot(wsp_ref[j], basis.astype(mm_dtype),
                            preferred_element_type=jnp.float32)

    o_ref[0] = acc.astype(o_ref.dtype)


def fastkan_layer_cols(cols, ln_gamma, ln_beta, w_spline_glo, w_base, b_base,
                       *, grid_pts, inv_denom, eps, tile_p=512,
                       mm_dtype=jnp.float32):
    """Apply FastKANLayer per pixel.  cols: (B, L, P)  ->  (B, C_out, P)."""
    b, l_dim, p = cols.shape
    g, o_dim, l2 = w_spline_glo.shape
    assert l2 == l_dim and w_base.shape == (o_dim, l_dim)

    # Lane tile along the pixel axis (multiple of 128, capped at P).
    tile = max(128, min(_round_up(tile_p, 128), _round_up(p, 128)))
    p_pad = _round_up(p, tile)
    if p_pad != p:
        # tanh/exp of the zero-padded columns are finite; rows are sliced off.
        cols = jnp.pad(cols, ((0, 0), (0, 0), (0, p_pad - p)))

    kernel = functools.partial(
        _fastkan_kernel, grid_pts=grid_pts, inv_denom=inv_denom, eps=eps,
        num_grids=g, mm_dtype=mm_dtype)

    out = pl.pallas_call(
        kernel,
        out_shape=jax.ShapeDtypeStruct((b, o_dim, p_pad), cols.dtype),
        grid_spec=pltpu.PrefetchScalarGridSpec(
            num_scalar_prefetch=0,
            grid=(b, p_pad // tile),
            in_specs=[
                pl.BlockSpec((1, l_dim, tile), lambda bi, pi: (bi, 0, pi)),
                pl.BlockSpec((l_dim, 1), lambda bi, pi: (0, 0)),
                pl.BlockSpec((l_dim, 1), lambda bi, pi: (0, 0)),
                pl.BlockSpec((g, o_dim, l_dim), lambda bi, pi: (0, 0, 0)),
                pl.BlockSpec((o_dim, l_dim), lambda bi, pi: (0, 0)),
                pl.BlockSpec((o_dim, 1), lambda bi, pi: (0, 0)),
            ],
            out_specs=pl.BlockSpec((1, o_dim, tile), lambda bi, pi: (bi, 0, pi)),
        ),
        compiler_params=pltpu.CompilerParams(
            dimension_semantics=("parallel", "parallel")),
    )(cols, ln_gamma, ln_beta,
      w_spline_glo.astype(mm_dtype), w_base.astype(mm_dtype), b_base)
    return out[:, :, :p]


# ----------------------------------------------------------------------------
# Glue: im2col matching torch.nn.functional.unfold (L ordered (c, kh, kw)).
# Loops only over k*k (not C*k*k) slices so trace time is independent of C_in.
# ----------------------------------------------------------------------------
def _unfold_nchw(x, kernel_size, stride, padding):
    b, c, h, w = x.shape
    k = kernel_size
    xp = jnp.pad(x, ((0, 0), (0, 0), (padding, padding), (padding, padding)))
    h_out = (h + 2 * padding - k) // stride + 1
    w_out = (w + 2 * padding - k) // stride + 1
    pieces = []
    for ih in range(k):
        for iw in range(k):
            pieces.append(
                xp[:, :,
                   ih: ih + stride * h_out: stride,
                   iw: iw + stride * w_out: stride])       # (B, C, Ho, Wo)
    cols = jnp.stack(pieces, axis=2)                       # (B, C, k*k, Ho, Wo)
    return cols.reshape(b, c * k * k, h_out * w_out), h_out, w_out


class FastKANConv2d:
    """JAX/Pallas port of the PyTorch FastKANConv2d (unfold + FastKANLayer)."""

    def __init__(self, in_channels, out_channels, kernel_size, stride=1,
                 padding=0, grid_min=-2.0, grid_max=2.0, num_grids=8,
                 use_base_update=True, spline_weight_init_scale=0.1,
                 tile_p=512, key=None):
        self.in_channels = in_channels
        self.out_channels = out_channels
        self.kernel_size = kernel_size
        self.stride = stride
        self.padding = padding
        self.num_grids = num_grids
        self.tile_p = tile_p
        self.eps = 1e-5
        self.input_dim = in_channels * kernel_size * kernel_size

        grid_np = np.linspace(grid_min, grid_max, num_grids).astype(np.float32)
        self.grid = jnp.asarray(grid_np)                    # for the reference
        self.grid_tuple = tuple(float(v) for v in grid_np)  # static constants
        self.denominator = float(grid_max - grid_min) / (num_grids - 1)

        if key is None:
            key = jax.random.PRNGKey(0)
        k_sp, k_bw, k_bb = jax.random.split(key, 3)
        L, O, G = self.input_dim, out_channels, num_grids
        # nn.LayerNorm default init.
        self.ln_gamma = jnp.ones((L,), jnp.float32)
        self.ln_beta = jnp.zeros((L,), jnp.float32)
        # SplineLinear: trunc_normal(std=spline_weight_init_scale), no bias.
        self.spline_weight = spline_weight_init_scale * jax.random.truncated_normal(
            k_sp, -2.0, 2.0, (O, L * G), jnp.float32)
        # Base nn.Linear (kaiming-uniform-style) init; zeros == no base update.
        bound = 1.0 / float(np.sqrt(L))
        if use_base_update:
            self.base_weight = jax.random.uniform(
                k_bw, (O, L), jnp.float32, -bound, bound)
            self.base_bias = jax.random.uniform(
                k_bb, (O,), jnp.float32, -bound, bound)
        else:
            self.base_weight = jnp.zeros((O, L), jnp.float32)
            self.base_bias = jnp.zeros((O,), jnp.float32)

    def __call__(self, x, mm_dtype=jnp.float32):
        # x is NCHW (B, C_in, H, W); output is NCHW (B, C_out, H_out, W_out).
        b, c, h, w = x.shape
        assert c == self.in_channels
        cols, h_out, w_out = _unfold_nchw(x, self.kernel_size, self.stride,
                                          self.padding)     # (B, L, P)
        L, O, G = self.input_dim, self.out_channels, self.num_grids
        # PyTorch spline weight (O, L*G) with flat index l*G + g  ->  (G, O, L)
        w_spline_glo = jnp.transpose(
            self.spline_weight.reshape(O, L, G), (2, 0, 1))
        out = fastkan_layer_cols(
            cols, self.ln_gamma.reshape(L, 1), self.ln_beta.reshape(L, 1),
            w_spline_glo, self.base_weight, self.base_bias.reshape(O, 1),
            grid_pts=self.grid_tuple, inv_denom=1.0 / self.denominator,
            eps=self.eps, tile_p=self.tile_p, mm_dtype=mm_dtype)
        return out.reshape(b, O, h_out, w_out)


# ----------------------------------------------------------------------------
# Pure-JAX reference (mirrors the PyTorch forward: unfold -> row-major layer).
# ----------------------------------------------------------------------------
def _reference_forward(m, x):
    cols, h_out, w_out = _unfold_nchw(x, m.kernel_size, m.stride, m.padding)
    b = x.shape[0]
    p = h_out * w_out
    L, O, G = m.input_dim, m.out_channels, m.num_grids
    x2d = jnp.transpose(cols, (0, 2, 1)).reshape(b * p, L)
    mean = jnp.mean(x2d, axis=-1, keepdims=True)
    var = jnp.mean((x2d - mean) ** 2, axis=-1, keepdims=True)
    xn = (x2d - mean) / jnp.sqrt(var + m.eps) * m.ln_gamma + m.ln_beta
    basis = jnp.exp(-(((xn[..., None] - m.grid) / m.denominator) ** 2))  # (N,L,G)
    ret = jnp.dot(basis.reshape(b * p, L * G), m.spline_weight.T,
                  precision=jax.lax.Precision.HIGHEST)
    base = jnp.dot(jax.nn.silu(x2d), m.base_weight.T,
                   precision=jax.lax.Precision.HIGHEST) + m.base_bias
    y = ret + base
    out = jnp.transpose(y.reshape(b, p, O), (0, 2, 1))
    return out.reshape(b, O, h_out, w_out)


if __name__ == "__main__":
    key = jax.random.PRNGKey(0)
    k_x, k_w = jax.random.split(key)

    batch, c_in, hw = 2, 4, 16
    x = jax.random.normal(k_x, (batch, c_in, hw, hw), dtype=jnp.float32)

    conv = FastKANConv2d(in_channels=c_in, out_channels=8, kernel_size=3,
                         stride=1, padding=1, key=k_w)

    out = jax.block_until_ready(conv(x))
    ref = jax.block_until_ready(_reference_forward(conv, x))

    assert out.shape == (batch, 8, hw, hw), out.shape
    # Tolerance covers MXU multi-pass rounding of the f32 matmuls.
    max_err = float(jnp.max(jnp.abs(out - ref)))
    assert jnp.allclose(out, ref, atol=5e-3, rtol=5e-3), max_err

    print("KERNEL_OK")
</pallas_src>

<mosaic_0001>
module attributes {stable_mosaic.version = 11 : i64} {
  func.func @_fastkan_kernel(%arg0: i32, %arg1: i32, %arg2: memref<1x36x256xf32, #tpu.memory_space<vmem>>, %arg3: memref<36x1xf32, #tpu.memory_space<vmem>>, %arg4: memref<36x1xf32, #tpu.memory_space<vmem>>, %arg5: memref<8x8x36xf32, #tpu.memory_space<vmem>>, %arg6: memref<8x36xf32, #tpu.memory_space<vmem>>, %arg7: memref<8x1xf32, #tpu.memory_space<vmem>>, %arg8: memref<1x8x256xf32, #tpu.memory_space<vmem>>) attributes {dimension_semantics = [#tpu.dimension_semantics<parallel>, #tpu.dimension_semantics<parallel>], iteration_bounds = array<i64: 2, 1>, scalar_prefetch = 0 : i64, scratch_operands = 0 : i64, tpu.core_type = #tpu.core_type<tc>, window_params = [{transform_indices = @transform_0, window_bounds = array<i64: 1, 36, 256>}, {pipeline_mode = #tpu.pipeline_mode<synchronous>, transform_indices = @transform_1, window_bounds = array<i64: 36, 1>}, {pipeline_mode = #tpu.pipeline_mode<synchronous>, transform_indices = @transform_2, window_bounds = array<i64: 36, 1>}, {pipeline_mode = #tpu.pipeline_mode<synchronous>, transform_indices = @transform_3, window_bounds = array<i64: 8, 8, 36>}, {pipeline_mode = #tpu.pipeline_mode<synchronous>, transform_indices = @transform_4, window_bounds = array<i64: 8, 36>}, {pipeline_mode = #tpu.pipeline_mode<synchronous>, transform_indices = @transform_5, window_bounds = array<i64: 8, 1>}, {transform_indices = @transform_6, window_bounds = array<i64: 1, 8, 256>}]} {
    %c0 = arith.constant 0 : index
    %c0_0 = arith.constant 0 : index
    %c0_1 = arith.constant 0 : index
    %0 = vector.load %arg2[%c0, %c0_0, %c0_1] : memref<1x36x256xf32, #tpu.memory_space<vmem>>, vector<1x36x256xf32>
    %1 = vector.shape_cast %0 : vector<1x36x256xf32> to vector<36x256xf32>
    %cst = arith.constant dense<0.000000e+00> : vector<256xf32>
    %2 = vector.multi_reduction <add>, %1, %cst [0] : vector<36x256xf32> to vector<256xf32>
    %3 = vector.shape_cast %2 : vector<256xf32> to vector<1x256xf32>
    %cst_2 = arith.constant 3.600000e+01 : f32
    %4 = vector.broadcast %cst_2 : f32 to vector<1x256xf32>
    %5 = arith.divf %3, %4 : vector<1x256xf32>
    %6 = vector.broadcast %5 : vector<1x256xf32> to vector<36x256xf32>
    %7 = arith.subf %1, %6 : vector<36x256xf32>
    %8 = arith.mulf %7, %7 : vector<36x256xf32>
    %cst_3 = arith.constant dense<0.000000e+00> : vector<256xf32>
    %9 = vector.multi_reduction <add>, %8, %cst_3 [0] : vector<36x256xf32> to vector<256xf32>
    %10 = vector.shape_cast %9 : vector<256xf32> to vector<1x256xf32>
    %cst_4 = arith.constant 3.600000e+01 : f32
    %11 = vector.broadcast %cst_4 : f32 to vector<1x256xf32>
    %12 = arith.divf %10, %11 : vector<1x256xf32>
    %cst_5 = arith.constant 9.99999974E-6 : f32
    %13 = vector.broadcast %cst_5 : f32 to vector<1x256xf32>
    %14 = arith.addf %12, %13 : vector<1x256xf32>
    %15 = math.rsqrt %14 : vector<1x256xf32>
    %16 = vector.broadcast %15 : vector<1x256xf32> to vector<36x256xf32>
    %17 = arith.mulf %7, %16 : vector<36x256xf32>
    %c0_6 = arith.constant 0 : index
    %c0_7 = arith.constant 0 : index
    %18 = vector.load %arg3[%c0_6, %c0_7] : memref<36x1xf32, #tpu.memory_space<vmem>>, vector<36x1xf32>
    %19 = vector.broadcast %18 : vector<36x1xf32> to vector<36x256xf32>
    %20 = arith.mulf %17, %19 : vector<36x256xf32>
    %c0_8 = arith.constant 0 : index
    %c0_9 = arith.constant 0 : index
    %21 = vector.load %arg4[%c0_8, %c0_9] : memref<36x1xf32, #tpu.memory_space<vmem>>, vector<36x1xf32>
    %22 = vector.broadcast %21 : vector<36x1xf32> to vector<36x256xf32>
    %23 = arith.addf %20, %22 : vector<36x256xf32>
    %cst_10 = arith.constant 5.000000e-01 : f32
    %24 = vector.broadcast %cst_10 : f32 to vector<36x256xf32>
    %25 = arith.mulf %24, %1 : vector<36x256xf32>
    %26 = math.tanh %25 : vector<36x256xf32>
    %cst_11 = arith.constant 1.000000e+00 : f32
    %27 = vector.broadcast %cst_11 : f32 to vector<36x256xf32>
    %28 = arith.addf %26, %27 : vector<36x256xf32>
    %cst_12 = arith.constant 5.000000e-01 : f32
    %29 = vector.broadcast %cst_12 : f32 to vector<36x256xf32>
    %30 = arith.mulf %29, %28 : vector<36x256xf32>
    %31 = arith.mulf %1, %30 : vector<36x256xf32>
    %c0_13 = arith.constant 0 : index
    %c0_14 = arith.constant 0 : index
    %32 = vector.load %arg6[%c0_13, %c0_14] : memref<8x36xf32, #tpu.memory_space<vmem>>, vector<8x36xf32>
    %cst_15 = arith.constant dense<0.000000e+00> : vector<8x256xf32>
    %33 = tpu.matmul %32, %31, %cst_15 {dimension_numbers = #tpu.dot_dimension_numbers<[1], [0], [0], [1], [0, 0, 1, 1], [], []>} : vector<8x36xf32>, vector<36x256xf32>, vector<8x256xf32> -> vector<8x256xf32>
    %c0_16 = arith.constant 0 : index
    %c0_17 = arith.constant 0 : index
    %34 = vector.load %arg7[%c0_16, %c0_17] : memref<8x1xf32, #tpu.memory_space<vmem>>, vector<8x1xf32>
    %35 = vector.broadcast %34 : vector<8x1xf32> to vector<8x256xf32>
    %36 = arith.addf %33, %35 : vector<8x256xf32>
    %cst_18 = arith.constant -2.000000e+00 : f32
    %37 = vector.broadcast %cst_18 : f32 to vector<36x256xf32>
    %38 = arith.subf %23, %37 : vector<36x256xf32>
    %cst_19 = arith.constant 1.750000e+00 : f32
    %39 = vector.broadcast %cst_19 : f32 to vector<36x256xf32>
    %40 = arith.mulf %38, %39 : vector<36x256xf32>
    %41 = arith.mulf %40, %40 : vector<36x256xf32>
    %cst_20 = arith.constant 0.000000e+00 : f32
    %42 = vector.broadcast %cst_20 : f32 to vector<36x256xf32>
    %43 = arith.subf %42, %41 : vector<36x256xf32>
    %44 = math.exp %43 : vector<36x256xf32>
    %c0_21 = arith.constant 0 : index
    %c0_22 = arith.constant 0 : index
    %c0_23 = arith.constant 0 : index
    %45 = vector.load %arg5[%c0_21, %c0_22, %c0_23] : memref<8x8x36xf32, #tpu.memory_space<vmem>>, vector<1x8x36xf32>
    %46 = vector.shape_cast %45 : vector<1x8x36xf32> to vector<8x36xf32>
    %cst_24 = arith.constant dense<0.000000e+00> : vector<8x256xf32>
    %47 = tpu.matmul %46, %44, %cst_24 {dimension_numbers = #tpu.dot_dimension_numbers<[1], [0], [0], [1], [0, 0, 1, 1], [], []>} : vector<8x36xf32>, vector<36x256xf32>, vector<8x256xf32> -> vector<8x256xf32>
    %48 = arith.addf %36, %47 : vector<8x256xf32>
    %cst_25 = arith.constant -1.42857146 : f32
    %49 = vector.broadcast %cst_25 : f32 to vector<36x256xf32>
    %50 = arith.subf %23, %49 : vector<36x256xf32>
    %cst_26 = arith.constant 1.750000e+00 : f32
    %51 = vector.broadcast %cst_26 : f32 to vector<36x256xf32>
    %52 = arith.mulf %50, %51 : vector<36x256xf32>
    %53 = arith.mulf %52, %52 : vector<36x256xf32>
    %cst_27 = arith.constant 0.000000e+00 : f32
    %54 = vector.broadcast %cst_27 : f32 to vector<36x256xf32>
    %55 = arith.subf %54, %53 : vector<36x256xf32>
    %56 = math.exp %55 : vector<36x256xf32>
    %c1 = arith.constant 1 : index
    %c0_28 = arith.constant 0 : index
    %c0_29 = arith.constant 0 : index
    %57 = vector.load %arg5[%c1, %c0_28, %c0_29] : memref<8x8x36xf32, #tpu.memory_space<vmem>>, vector<1x8x36xf32>
    %58 = vector.shape_cast %57 : vector<1x8x36xf32> to vector<8x36xf32>
    %cst_30 = arith.constant dense<0.000000e+00> : vector<8x256xf32>
    %59 = tpu.matmul %58, %56, %cst_30 {dimension_numbers = #tpu.dot_dimension_numbers<[1], [0], [0], [1], [0, 0, 1, 1], [], []>} : vector<8x36xf32>, vector<36x256xf32>, vector<8x256xf32> -> vector<8x256xf32>
    %60 = arith.addf %48, %59 : vector<8x256xf32>
    %cst_31 = arith.constant -0.857142865 : f32
    %61 = vector.broadcast %cst_31 : f32 to vector<36x256xf32>
    %62 = arith.subf %23, %61 : vector<36x256xf32>
    %cst_32 = arith.constant 1.750000e+00 : f32
    %63 = vector.broadcast %cst_32 : f32 to vector<36x256xf32>
    %64 = arith.mulf %62, %63 : vector<36x256xf32>
    %65 = arith.mulf %64, %64 : vector<36x256xf32>
    %cst_33 = arith.constant 0.000000e+00 : f32
    %66 = vector.broadcast %cst_33 : f32 to vector<36x256xf32>
    %67 = arith.subf %66, %65 : vector<36x256xf32>
    %68 = math.exp %67 : vector<36x256xf32>
    %c2 = arith.constant 2 : index
    %c0_34 = arith.constant 0 : index
    %c0_35 = arith.constant 0 : index
    %69 = vector.load %arg5[%c2, %c0_34, %c0_35] : memref<8x8x36xf32, #tpu.memory_space<vmem>>, vector<1x8x36xf32>
    %70 = vector.shape_cast %69 : vector<1x8x36xf32> to vector<8x36xf32>
    %cst_36 = arith.constant dense<0.000000e+00> : vector<8x256xf32>
    %71 = tpu.matmul %70, %68, %cst_36 {dimension_numbers = #tpu.dot_dimension_numbers<[1], [0], [0], [1], [0, 0, 1, 1], [], []>} : vector<8x36xf32>, vector<36x256xf32>, vector<8x256xf32> -> vector<8x256xf32>
    %72 = arith.addf %60, %71 : vector<8x256xf32>
    %cst_37 = arith.constant -0.285714298 : f32
    %73 = vector.broadcast %cst_37 : f32 to vector<36x256xf32>
    %74 = arith.subf %23, %73 : vector<36x256xf32>
    %cst_38 = arith.constant 1.750000e+00 : f32
    %75 = vector.broadcast %cst_38 : f32 to vector<36x256xf32>
    %76 = arith.mulf %74, %75 : vector<36x256xf32>
    %77 = arith.mulf %76, %76 : vector<36x256xf32>
    %cst_39 = arith.constant 0.000000e+00 : f32
    %78 = vector.broadcast %cst_39 : f32 to vector<36x256xf32>
    %79 = arith.subf %78, %77 : vector<36x256xf32>
    %80 = math.exp %79 : vector<36x256xf32>
    %c3 = arith.constant 3 : index
    %c0_40 = arith.constant 0 : index
    %c0_41 = arith.constant 0 : index
    %81 = vector.load %arg5[%c3, %c0_40, %c0_41] : memref<8x8x36xf32, #tpu.memory_space<vmem>>, vector<1x8x36xf32>
    %82 = vector.shape_cast %81 : vector<1x8x36xf32> to vector<8x36xf32>
    %cst_42 = arith.constant dense<0.000000e+00> : vector<8x256xf32>
    %83 = tpu.matmul %82, %80, %cst_42 {dimension_numbers = #tpu.dot_dimension_numbers<[1], [0], [0], [1], [0, 0, 1, 1], [], []>} : vector<8x36xf32>, vector<36x256xf32>, vector<8x256xf32> -> vector<8x256xf32>
    %84 = arith.addf %72, %83 : vector<8x256xf32>
    %cst_43 = arith.constant 0.285714298 : f32
    %85 = vector.broadcast %cst_43 : f32 to vector<36x256xf32>
    %86 = arith.subf %23, %85 : vector<36x256xf32>
    %cst_44 = arith.constant 1.750000e+00 : f32
    %87 = vector.broadcast %cst_44 : f32 to vector<36x256xf32>
    %88 = arith.mulf %86, %87 : vector<36x256xf32>
    %89 = arith.mulf %88, %88 : vector<36x256xf32>
    %cst_45 = arith.constant 0.000000e+00 : f32
    %90 = vector.broadcast %cst_45 : f32 to vector<36x256xf32>
    %91 = arith.subf %90, %89 : vector<36x256xf32>
    %92 = math.exp %91 : vector<36x256xf32>
    %c4 = arith.constant 4 : index
    %c0_46 = arith.constant 0 : index
    %c0_47 = arith.constant 0 : index
    %93 = vector.load %arg5[%c4, %c0_46, %c0_47] : memref<8x8x36xf32, #tpu.memory_space<vmem>>, vector<1x8x36xf32>
    %94 = vector.shape_cast %93 : vector<1x8x36xf32> to vector<8x36xf32>
    %cst_48 = arith.constant dense<0.000000e+00> : vector<8x256xf32>
    %95 = tpu.matmul %94, %92, %cst_48 {dimension_numbers = #tpu.dot_dimension_numbers<[1], [0], [0], [1], [0, 0, 1, 1], [], []>} : vector<8x36xf32>, vector<36x256xf32>, vector<8x256xf32> -> vector<8x256xf32>
    %96 = arith.addf %84, %95 : vector<8x256xf32>
    %cst_49 = arith.constant 0.857142865 : f32
    %97 = vector.broadcast %cst_49 : f32 to vector<36x256xf32>
    %98 = arith.subf %23, %97 : vector<36x256xf32>
    %cst_50 = arith.constant 1.750000e+00 : f32
    %99 = vector.broadcast %cst_50 : f32 to vector<36x256xf32>
    %100 = arith.mulf %98, %99 : vector<36x256xf32>
    %101 = arith.mulf %100, %100 : vector<36x256xf32>
    %cst_51 = arith.constant 0.000000e+00 : f32
    %102 = vector.broadcast %cst_51 : f32 to vector<36x256xf32>
    %103 = arith.subf %102, %101 : vector<36x256xf32>
    %104 = math.exp %103 : vector<36x256xf32>
    %c5 = arith.constant 5 : index
    %c0_52 = arith.constant 0 : index
    %c0_53 = arith.constant 0 : index
    %105 = vector.load %arg5[%c5, %c0_52, %c0_53] : memref<8x8x36xf32, #tpu.memory_space<vmem>>, vector<1x8x36xf32>
    %106 = vector.shape_cast %105 : vector<1x8x36xf32> to vector<8x36xf32>
    %cst_54 = arith.constant dense<0.000000e+00> : vector<8x256xf32>
    %107 = tpu.matmul %106, %104, %cst_54 {dimension_numbers = #tpu.dot_dimension_numbers<[1], [0], [0], [1], [0, 0, 1, 1], [], []>} : vector<8x36xf32>, vector<36x256xf32>, vector<8x256xf32> -> vector<8x256xf32>
    %108 = arith.addf %96, %107 : vector<8x256xf32>
    %cst_55 = arith.constant 1.42857146 : f32
    %109 = vector.broadcast %cst_55 : f32 to vector<36x256xf32>
    %110 = arith.subf %23, %109 : vector<36x256xf32>
    %cst_56 = arith.constant 1.750000e+00 : f32
    %111 = vector.broadcast %cst_56 : f32 to vector<36x256xf32>
    %112 = arith.mulf %110, %111 : vector<36x256xf32>
    %113 = arith.mulf %112, %112 : vector<36x256xf32>
    %cst_57 = arith.constant 0.000000e+00 : f32
    %114 = vector.broadcast %cst_57 : f32 to vector<36x256xf32>
    %115 = arith.subf %114, %113 : vector<36x256xf32>
    %116 = math.exp %115 : vector<36x256xf32>
    %c6 = arith.constant 6 : index
    %c0_58 = arith.constant 0 : index
    %c0_59 = arith.constant 0 : index
    %117 = vector.load %arg5[%c6, %c0_58, %c0_59] : memref<8x8x36xf32, #tpu.memory_space<vmem>>, vector<1x8x36xf32>
    %118 = vector.shape_cast %117 : vector<1x8x36xf32> to vector<8x36xf32>
    %cst_60 = arith.constant dense<0.000000e+00> : vector<8x256xf32>
    %119 = tpu.matmul %118, %116, %cst_60 {dimension_numbers = #tpu.dot_dimension_numbers<[1], [0], [0], [1], [0, 0, 1, 1], [], []>} : vector<8x36xf32>, vector<36x256xf32>, vector<8x256xf32> -> vector<8x256xf32>
    %120 = arith.addf %108, %119 : vector<8x256xf32>
    %cst_61 = arith.constant 2.000000e+00 : f32
    %121 = vector.broadcast %cst_61 : f32 to vector<36x256xf32>
    %122 = arith.subf %23, %121 : vector<36x256xf32>
    %cst_62 = arith.constant 1.750000e+00 : f32
    %123 = vector.broadcast %cst_62 : f32 to vector<36x256xf32>
    %124 = arith.mulf %122, %123 : vector<36x256xf32>
    %125 = arith.mulf %124, %124 : vector<36x256xf32>
    %cst_63 = arith.constant 0.000000e+00 : f32
    %126 = vector.broadcast %cst_63 : f32 to vector<36x256xf32>
    %127 = arith.subf %126, %125 : vector<36x256xf32>
    %128 = math.exp %127 : vector<36x256xf32>
    %c7 = arith.constant 7 : index
    %c0_64 = arith.constant 0 : index
    %c0_65 = arith.constant 0 : index
    %129 = vector.load %arg5[%c7, %c0_64, %c0_65] : memref<8x8x36xf32, #tpu.memory_space<vmem>>, vector<1x8x36xf32>
    %130 = vector.shape_cast %129 : vector<1x8x36xf32> to vector<8x36xf32>
    %cst_66 = arith.constant dense<0.000000e+00> : vector<8x256xf32>
    %131 = tpu.matmul %130, %128, %cst_66 {dimension_numbers = #tpu.dot_dimension_numbers<[1], [0], [0], [1], [0, 0, 1, 1], [], []>} : vector<8x36xf32>, vector<36x256xf32>, vector<8x256xf32> -> vector<8x256xf32>
    %132 = arith.addf %120, %131 : vector<8x256xf32>
    %c0_67 = arith.constant 0 : index
    %c0_68 = arith.constant 0 : index
    %c0_69 = arith.constant 0 : index
    %133 = vector.load %arg8[%c0_67, %c0_68, %c0_69] : memref<1x8x256xf32, #tpu.memory_space<vmem>>, vector<1x8x256xf32>
    %134 = vector.shape_cast %133 : vector<1x8x256xf32> to vector<8x256xf32>
    %135 = vector.shape_cast %132 : vector<8x256xf32> to vector<1x8x256xf32>
    tpu.vector_store %arg8[%c0_67, %c0_68, %c0_69], %135 {strides = array<i32>} : memref<1x8x256xf32, #tpu.memory_space<vmem>>, vector<1x8x256xf32>,
    return
  }
  func.func @transform_0(%arg0: i32, %arg1: i32) -> (i32, i32, i32) {
    %c0_i32 = arith.constant 0 : i32
    %c0_i32_0 = arith.constant 0 : i32
    return %arg0, %c0_i32, %arg1 : i32, i32, i32
  }
  func.func @transform_1(%arg0: i32, %arg1: i32) -> (i32, i32) {
    %c0_i32 = arith.constant 0 : i32
    %c0_i32_0 = arith.constant 0 : i32
    %c0_i32_1 = arith.constant 0 : i32
    return %c0_i32, %c0_i32_0 : i32, i32
  }
  func.func @transform_2(%arg0: i32, %arg1: i32) -> (i32, i32) {
    %c0_i32 = arith.constant 0 : i32
    %c0_i32_0 = arith.constant 0 : i32
    %c0_i32_1 = arith.constant 0 : i32
    return %c0_i32, %c0_i32_0 : i32, i32
  }
  func.func @transform_3(%arg0: i32, %arg1: i32) -> (i32, i32, i32) {
    %c0_i32 = arith.constant 0 : i32
    %c0_i32_0 = arith.constant 0 : i32
    %c0_i32_1 = arith.constant 0 : i32
    %c0_i32_2 = arith.constant 0 : i32
    return %c0_i32, %c0_i32_0, %c0_i32_1 : i32, i32, i32
  }
  func.func @transform_4(%arg0: i32, %arg1: i32) -> (i32, i32) {
    %c0_i32 = arith.constant 0 : i32
    %c0_i32_0 = arith.constant 0 : i32
    %c0_i32_1 = arith.constant 0 : i32
    return %c0_i32, %c0_i32_0 : i32, i32
  }
  func.func @transform_5(%arg0: i32, %arg1: i32) -> (i32, i32) {
    %c0_i32 = arith.constant 0 : i32
    %c0_i32_0 = arith.constant 0 : i32
    %c0_i32_1 = arith.constant 0 : i32
    return %c0_i32, %c0_i32_0 : i32, i32
  }
  func.func @transform_6(%arg0: i32, %arg1: i32) -> (i32, i32, i32) {
    %c0_i32 = arith.constant 0 : i32
    %c0_i32_0 = arith.constant 0 : i32
    return %arg0, %c0_i32, %arg1 : i32, i32, i32
  }
}

</mosaic_0001>

<bundles_post_ra>
// kernel: tpu_custom_call.1
= control target key start
LH: loop header
LB: loop body
LE: loop exit
PB: predicated region body
PF: predicated region fallthrough
CT: control target
= control target key end

     0   :  { %11 = vsyncpa [#allocation3], 0  ;;  %s2946_s0 = inlined_call_operand.vmem [shape: f32[2,36,256], index: 0, kind: input, shape index: {}]   ;;  %s2947_s1 = inlined_call_operand.vmem [shape: f32[36,1], index: 1, kind: input, shape index: {}]   ;;  %s2948_s2 = inlined_call_operand.vmem [shape: f32[36,1], index: 2, kind: input, shape index: {}]   ;;  %s2949_s3 = inlined_call_operand.vmem [shape: f32[8,8,36], index: 3, kind: input, shape index: {}]   ;;  %s2950_s4 = inlined_call_operand.vmem [shape: f32[8,36], index: 4, kind: input, shape index: {}]   ;;  %s2951_s5 = inlined_call_operand.vmem [shape: f32[8,1], index: 5, kind: input, shape index: {}]   ;;  %s2952_s6 = inlined_call_operand.hbm [shape: f32[2,8,256], index: 6, kind: output, shape index: {}]  }
   0x1   :  { %13 = vsyncpa [#allocation3 + $0x1], 0  ;;  %s2418_s21 = smov 0   ;;  %s2420_s22 = smov 0  }
   0x2   :  { %s2422_s23 = smov 0   ;;  %s2424_s24 = smov 0  }
   0x3   :  { %s2426_s25 = smov 0   ;;  %s2428_s26 = smov 0  }
   0x4 LB: > { %s1839_s27 = sadd.s32 4294967295, %s2378_s26   ;;  %s1840_s28 = sadd.s32 4294967294, %s2378_s26   ;;  %s2378_s26 = sphi %s2428_s26, %s19_s26   ;;  %s2374_s25 = sphi %s2426_s25, %s2959_s25   ;;  %s2370_s24 = sphi %s2424_s24, %s2958_s24   ;;  %s2366_s23 = sphi %s2422_s23, %s2957_s23   ;;  %s2362_s22 = sphi %s2420_s22, %s2956_s22   ;;  %s2358_s21 = sphi %s2418_s21, %s2955_s21  }
   0x5   : > { %s31_s29 = sadd.s32 1, %s2374_s25  ;;  %s173_s30 = sadd.s32 1, %s2366_s23 }
   0x6   : > { %p33_p0 = scmp.ge.s32.totalorder %s31_s29, 2  ;;  %p183_p1 = scmp.ne.s32.totalorder %s2366_s23, %s2362_s22 }
   0x7   : > { %p184_p2 = scmp.eq.s32.totalorder %s1839_s27, 1  ;;  %p189_p3 = scmp.ne.s32.totalorder %s2362_s22, %s2358_s21 }
   0x8   : > { %s2961_s29 = smov (%p33_p0, %s31_s29), 0  ;;  %p190_p5 = scmp.eq.s32.totalorder %s1840_s28, 1 }
   0x9   : > { %p2458_p4 = por %p184_p2, %p183_p1  ;;  %s168_s8 = ssub.s32 %s2374_s25, %s2961_s29 }
   0xa   : > { %p1843_p6 = scmp.ge.s32.totalorder %s2378_s26, 1  ;;  %p171_p7 = scmp.eq.s32.totalorder %s168_s8, 0 }
   0xb   : > { %p2465_p8 = por %p190_p5, %p189_p3  ;;  %p236_p9 = scmp.lt.s32.totalorder %s2378_s26, 3 }
   0xc   : > { %s2471_s10 = scalar_select %p171_p7, %s2366_s23, %s173_s30  }
   0xd   : > { %p237_p10 = pnand %p1843_p6, %p236_p9 }
   0xe   : > { %v415_v0 = vld [vmem:[%s2948_s2] sm:$0xff] (!%p237_p10)  ;;  %p271_p11 = scmp.lt.s32.totalorder (!%p237_p10), %s2370_s24, 1  ;;  %v2380_v2 = vmov (!%p237_p10), 0   ;;  %v416_v3 = vld [vmem:[%s2948_s2 + $0x8] sm:$0xff] (!%p237_p10)  ;;  %v378_v5 = vld [vmem:[%s2947_s1 + $0x18] sm:$0xff] (!%p237_p10)  ;;  %vm294_vm0 = vcmask (!%p237_p10), 1043456  }
   0xf   : > { %240 = sbr.rel (%p237_p10) target bundleno = 528 (0x210), region = 44  ;;  %v375_v1 = vld [vmem:[%s2947_s1] sm:$0xff] (!%p237_p10)  ;;  %2115 = vset.pattern.permute.xlu1 (!%p237_p10), %v2380_v2  ;;  %2114 = vset.pattern.permute.xlu0 (!%p237_p10), %v2380_v2  ;;  %v376_v4 = vld [vmem:[%s2947_s1 + $0x8] sm:$0xff] (!%p237_p10)  ;;  %v377_v6 = vld [vmem:[%s2947_s1 + $0x10] sm:$0xff] (!%p237_p10)  ;;  %vm512_vm1 = vcmask (!%p237_p10), 293888   ;;  %s267_s14 = sand.u32 (!%p237_p10), 1, %s2362_s22  }
  0x10   : > { %422 = vperm.xlu1 (!%p237_p10), %2115, %v415_v0   ;;  %382 = vperm.xlu0 (!%p237_p10), %2114, %v375_v1   ;;  %v418_v20 = vld [vmem:[%s2948_s2 + $0x18] sm:$0xff] (!%p237_p10)  ;;  %v417_v21 = vld [vmem:[%s2948_s2 + $0x10] sm:$0xff] (!%p237_p10)  ;;  %v419_v28 = vld [vmem:[%s2948_s2 + $0x20] sm:$0xf] (!%p237_p10)  ;;  %s1965_s16 = sshll.u32 (!%p237_p10), %s2370_s24, 8  ;;  %s2382_s30 = smov (!%p237_p10), [#allocation2]  }
  0x11   : > { %v379_v29 = vld [vmem:[%s2947_s1 + $0x20] sm:$0xf] (!%p237_p10)  ;;  %s2899_s27 = scalar_lea.hbm (!%p237_p10), %s2952_s6, %s1965_s16  ;;  %s2304_s8 = sshll.u32 (!%p237_p10), %s2382_s30, 4  ;;  %s2305_s8 = int_to_ptr.vmem [resolvable:$false] %s2304_s8 }
  0x12   : > { %v506_v34 = vld [vmem:[%s2951_s5] sm:$0xff] (!%p237_p10)  ;;  %s2306_s11 = scalar_lea.vmem (!%p237_p10), %s2305_s8, 512 }
  0x14   : > { %427 = vperm.xlu1 (!%p237_p10), %2115, %v416_v3   ;;  %387 = vperm.xlu0 (!%p237_p10), %2114, %v376_v4  }
  0x16   : > { %s272_s15 = scalar_select %p271_p11, %s2370_s24, 1 }
  0x17   : > { %s1747_s24 = scalar_lea.sflag [#allocation3], %s267_s14 }
  0x18   : > { %s2056_s20 = smul.u32 80, %s272_s15  ;;  %397 = vperm.xlu1 %2115, %v378_v5   ;;  %392 = vperm.xlu0 %2114, %v377_v6   ;;  %s1844_s15 = sshll.u32 %s267_s14, 4 }
  0x19   : > { %s269_s17 = scalar_lea.vmem [#allocation2], %s1844_s15 }
  0x1a   : > { %s278_s13 = scalar_lea.vmem %s2946_s0, %s2056_s20  ;;  %s1763_s18 = sshll.u32 %s269_s17, 4  ;;  %s2901_s18 = int_to_ptr.vmem [resolvable:$true] %s1763_s18 }
  0x1b   : > { %v2496_v7 = vld [vmem:[%s278_s13] sm:$0xff]  ;;  %v2498_v8 = vld [vmem:[%s278_s13 + $0x8] sm:$0xff]  ;;  %v2500_v9 = vld [vmem:[%s278_s13 + $0x10] sm:$0xff]  ;;  %s2300_s28 = scalar_lea.vmem %s2901_s18, 256  ;;  %p2307_p1 = scmp.lt.s32.totalorder %s2901_s18, %s2305_s8 }
  0x1c   : > { %v2502_v10 = vld [vmem:[%s278_s13 + $0x18] sm:$0xff]  ;;  %v2504_v11 = vld [vmem:[%s278_s13 + $0x20] sm:$0xff]  ;;  %v2506_v12 = vld [vmem:[%s278_s13 + $0x28] sm:$0xff]  ;;  %v291_v13 = vadd.f32 %v2500_v9, %v2496_v7  ;;  %437 = vperm.xlu1 %2115, %v418_v20   ;;  %432 = vperm.xlu0 %2114, %v417_v21   ;;  %v456_v39 = vmul.f32 0.5, %v2498_v8  ;;  %v455_v42 = vmul.f32 0.5, %v2496_v7  ;;  %v457_v43 = vmul.f32 0.5, %v2500_v9  ;;  %p2301_p12 = scmp.ne.s32.totalorder %s2901_s18, %s2300_s28  ;;  %p2308_p2 = scmp.lt.s32.totalorder %s2306_s11, %s2300_s28 }
  0x1d   : > { %v2510_v14 = vld [vmem:[%s278_s13 + $0x30] sm:$0xff]  ;;  %v2512_v15 = vld [vmem:[%s278_s13 + $0x40] sm:$0xf]  ;;  %v303_v16 = vadd.f32 %v2502_v10, %v2498_v8  ;;  %v2516_v17 = vld [vmem:[%s278_s13 + $0x38] sm:$0xff]  ;;  %v458_v40 = vmul.f32 0.5, %v2502_v10  ;;  %v460_v47 = vmul.f32 0.5, %v2506_v12 }
  0x1e   : > { %v2518_v18 = vld [vmem:[%s278_s13 + $0x48] sm:$0xf]  ;;  %v292_v19 = vadd.f32 %v291_v13, %v2504_v11  ;;  %v295_v22 = vsel %vm294_vm0, %v2512_v15, 0.0  ;;  %2116 = vtanh.f32 %v456_v39  ;;  %v462_v48 = vmul.f32 0.5, %v2516_v17  ;;  %p2302_p13 = pnand %p2301_p12, %p2458_p4  ;;  %p2309_p3 = por %p2308_p2, %p2307_p1 }
  0x1f   : > { %v304_v23 = vadd.f32 %v303_v16, %v2506_v12  ;;  %v306_v25 = vsel %vm294_vm0, %v2518_v18, 0.0  ;;  %2118 = vtanh.f32 %v458_v40  ;;  %v459_v52 = vmul.f32 0.5, %v2504_v11 }
  0x20   : > { %v293_v24 = vadd.f32 %v292_v19, %v2510_v14  ;;  %442 = vperm.xlu1 %2115, %v419_v28   ;;  %402 = vperm.xlu0 %2114, %v379_v29   ;;  %2120 = vtanh.f32 %v455_v42  ;;  %v461_v53 = vmul.f32 0.5, %v2510_v14  ;;  %p2303_p0 = pneg %p2302_p13 }
  0x21   : > { %v305_v26 = vadd.f32 %v304_v23, %v2516_v17  ;;  %2122 = vtanh.f32 %v457_v43 }
  0x22   : > { %v296_v27 = vadd.f32 %v295_v22, %v293_v24  ;;  %2124 = vtanh.f32 %v460_v47  ;;  %p2310_p5 = pnand %p2309_p3, %p2303_p0 }
  0x23   : > { %v307_v30 = vadd.f32 %v306_v25, %v305_v26  ;;  %2126 = vtanh.f32 %v462_v48 }
  0x24   : > { %v297_v31 = vrot.slane %v296_v27, 4  ;;  %509 = vperm.xlu0 %2114, %v506_v34   ;;  %2128 = vtanh.f32 %v459_v52 }
  0x25   : > { %v308_v32 = vrot.slane %v307_v30, 4  ;;  %2130 = vtanh.f32 %v461_v53 }
  0x26   : > { %v298_v33 = vadd.f32 %v297_v31, %v296_v27 }
  0x27   : > { %v309_v35 = vadd.f32 %v308_v32, %v307_v30 }
  0x28   : > { %v299_v36 = vrot.slane %v298_v33, 2  ;;  %v2117_v6 = vpop.eup %2116 }
  0x29   : > { %v310_v37 = vrot.slane %v309_v35, 2  ;;  %v2119_v21 = vpop.eup %2118  ;;  %v476_v24 = vadd.f32 1.0, %v2117_v6 }
  0x2a   : > { %v300_v38 = vadd.f32 %v299_v36, %v298_v33  ;;  %v2121_v25 = vpop.eup %2120  ;;  %v478_v28 = vadd.f32 1.0, %v2119_v21 }
  0x2b   : > { %v311_v41 = vadd.f32 %v310_v37, %v309_v35  ;;  %v2123_v29 = vpop.eup %2122  ;;  %v486_v32 = vmul.f32 0.5, %v476_v24  ;;  %v475_v33 = vadd.f32 1.0, %v2121_v25  ;;  %v464_v37 = vmul.f32 0.5, %v2518_v18 }
  0x2c   : > { %v301_v44 = vrot.slane %v300_v38, 1  ;;  %v2125_v34 = vpop.eup %2124  ;;  %v488_v35 = vmul.f32 0.5, %v478_v28  ;;  %v477_v36 = vadd.f32 1.0, %v2123_v29 }
  0x2d   : > { %v312_v45 = vrot.slane %v311_v41, 1  ;;  %v2127_v39 = vpop.eup %2126  ;;  %v496_v42 = vmul.f32 %v486_v32, %v2498_v8  ;;  %v485_v43 = vmul.f32 0.5, %v475_v33  ;;  %2132 = vtanh.f32 %v464_v37 }
  0x2e   : > { %v302_v46 = vadd.f32 %v301_v44, %v300_v38  ;;  %v463_v38 = vmul.f32 0.5, %v2512_v15  ;;  %v498_v44 = vmul.f32 %v488_v35, %v2502_v10  ;;  %v482_v47 = vadd.f32 1.0, %v2127_v39 }
  0x2f   : > { %v313_v49 = vadd.f32 %v312_v45, %v311_v41  ;;  %v487_v45 = vmul.f32 0.5, %v477_v36  ;;  %v2381_v33 = vmov 0.0  }
  0x30   : > { %v315_v50 = vmul.f32 0.027777778, %v302_v46  ;;  %v480_v46 = vadd.f32 1.0, %v2125_v34  ;;  %2134 = vtanh.f32 %v463_v38  ;;  %586 = vmatprep.mubr.f32.mxu1 %v2381_v33  ;;  %1159 = vmatprep.mubr.f32.mxu0 %v2381_v33 }
  0x31   : > { %v316_v51 = vmul.f32 0.027777778, %v313_v49  ;;  %v497_v52 = vmul.f32 %v487_v45, %v2500_v9 }
  0x32   : > { %v2552_v54 = vsub.f32 %v2496_v7, %v315_v50  ;;  %v2555_v55 = vsub.f32 %v2500_v9, %v315_v50  ;;  %v2558_v56 = vsub.f32 %v2504_v11, %v315_v50  ;;  %v2561_v57 = vsub.f32 %v2510_v14, %v315_v50 }
  0x33   : > { %v2564_v58 = vsub.f32 %v2498_v8, %v316_v51  ;;  %v2567_v59 = vsub.f32 %v2502_v10, %v316_v51  ;;  %v2570_v60 = vsub.f32 %v2506_v12, %v316_v51  ;;  %v2573_v61 = vsub.f32 %v2516_v17, %v316_v51 }
  0x34   : > { %v2576_v62 = vsub.f32 %v2512_v15, %v315_v50  ;;  %v2579_v63 = vsub.f32 %v2518_v18, %v316_v51  ;;  %v327_v0 = vmul.f32 %v2552_v54, %v2552_v54  ;;  %v329_v1 = vmul.f32 %v2555_v55, %v2555_v55 }
  0x35   : > { %v328_v2 = vmul.f32 %v2564_v58, %v2564_v58  ;;  %v330_v3 = vmul.f32 %v2567_v59, %v2567_v59  ;;  %v331_v4 = vmul.f32 %v2558_v56, %v2558_v56  ;;  %v332_v5 = vmul.f32 %v2570_v60, %v2570_v60 }
  0x36   : > { %v333_v13 = vmul.f32 %v2561_v57, %v2561_v57  ;;  %v334_v16 = vmul.f32 %v2573_v61, %v2573_v61  ;;  %v335_v19 = vmul.f32 %v2576_v62, %v2576_v62  ;;  %v336_v20 = vmul.f32 %v2579_v63, %v2579_v63 }
  0x37   : > { %v337_v22 = vadd.f32 %v329_v1, %v327_v0  ;;  %v348_v23 = vadd.f32 %v330_v3, %v328_v2  ;;  %v495_v50 = vmul.f32 %v485_v43, %v2496_v7  ;;  %v1966_v51 = vpack.c.bf16 %v498_v44, %v496_v42 }
  0x38   : > { %v340_v26 = vsel %vm294_vm0, %v335_v19, 0.0  ;;  %v351_v27 = vsel %vm294_vm0, %v336_v20, 0.0  ;;  %v490_v53 = vmul.f32 0.5, %v480_v46  ;;  %v492_v0 = vmul.f32 0.5, %v482_v47 }
  0x39   : > { %v338_v30 = vadd.f32 %v337_v22, %v331_v4  ;;  %v349_v31 = vadd.f32 %v348_v23, %v332_v5  ;;  %1967 = vmatprep.subr.bf16.mxu1 %v1966_v51  ;;  %v1968_v8 = vpack.c.bf16 %v497_v52, %v495_v50  ;;  %v2129_v4 = vpop.eup %2128 }
  0x3a   : > { %v500_v10 = vmul.f32 %v490_v53, %v2506_v12  ;;  %v502_v3 = vmul.f32 %v492_v0, %v2516_v17 }
  0x3b   : > { %v339_v40 = vadd.f32 %v338_v30, %v333_v13  ;;  %v350_v41 = vadd.f32 %v349_v31, %v334_v16  ;;  %v2131_v13 = vpop.eup %2130  ;;  %1969 = vmatpush1.bf16.msra.mxu1 %v1968_v8  ;;  %v479_v16 = vadd.f32 1.0, %v2129_v4 }
  0x3c   : > { %v1970_v7 = vpack.c.bf16 %v502_v3, %v500_v10  ;;  %v481_v20 = vadd.f32 1.0, %v2131_v13  ;;  %v2133_v12 = vpop.eup %2132 }
  0x3d   : > { %v341_v48 = vadd.f32 %v340_v26, %v339_v40  ;;  %v352_v49 = vadd.f32 %v351_v27, %v350_v41  ;;  %v489_v21 = vmul.f32 0.5, %v479_v16  ;;  %v484_v28 = vadd.f32 1.0, %v2133_v12  ;;  %v2135_v29 = vpop.eup %2134  ;;  %v505_v41 = vld [vmem:[%s2950_s4] sm:$0xff] }
  0x3e   : > { %1971 = vmatprep.subr.bf16.mxu1 %v1970_v7  ;;  %v491_v24 = vmul.f32 0.5, %v481_v20  ;;  %v483_v35 = vadd.f32 1.0, %v2135_v29 }
  0x3f   : > { %v342_v1 = vrot.slane %v341_v48, 4  ;;  %v353_v2 = vrot.slane %v352_v49, 4  ;;  %v499_v25 = vmul.f32 %v489_v21, %v2504_v11  ;;  %v494_v34 = vmul.f32 0.5, %v484_v28 }
  0x40   : > { %v501_v27 = vmul.f32 %v491_v24, %v2510_v14  ;;  %v493_v38 = vmul.f32 0.5, %v483_v35 }
  0x41   : > { %v343_v5 = vadd.f32 %v342_v1, %v341_v48  ;;  %v354_v6 = vadd.f32 %v353_v2, %v352_v49  ;;  %v504_v11 = vmul.f32 %v494_v34, %v2518_v18 }
  0x42   : > { %v1972_v32 = vpack.c.bf16 %v501_v27, %v499_v25  ;;  %v503_v40 = vmul.f32 %v493_v38, %v2512_v15 }
  0x43   : > { %v344_v19 = vrot.slane %v343_v5, 2  ;;  %v355_v9 = vrot.slane %v354_v6, 2 }
  0x44   : > { %1973 = vmatpush1.bf16.msra.mxu1 %v1972_v32 }
  0x45   : > { %v345_v22 = vadd.f32 %v344_v19, %v343_v5  ;;  %v356_v23 = vadd.f32 %v355_v9, %v354_v6  ;;  %1846 = vmatprep.subr.msk.mxu1 %vm294_vm0, %v504_v11 }
  0x47   : > { %v346_v26 = vrot.slane %v345_v22, 1  ;;  %v357_v17 = vrot.slane %v356_v23, 1 }
  0x48   : > { %1847 = vmatpush1.msk.msra.mxu1 %vm294_vm0, %v503_v40 }
  0x49   : > { %v347_v30 = vadd.f32 %v346_v26, %v345_v22  ;;  %v358_v31 = vadd.f32 %v357_v17, %v356_v23  ;;  %1848 = vmatmul.mubr.msk.f32.vlgmr.msra.gmra.mrb[0].mxu1 %vm512_vm1, %v505_v41 }
  0x4a   : > { %727 = vmatprep.mubr.f32.mxu1 %v2381_v33 }
  0x4b   : > { %v359_v36 = vmul.f32 0.027777778, %v347_v30  ;;  %v360_v37 = vmul.f32 0.027777778, %v358_v31 }
  0x4d   : > { %v361_v39 = vadd.f32 1e-05, %v359_v36  ;;  %v362_v14 = vadd.f32 1e-05, %v360_v37 }
  0x4f   : > { %2136 = vrsqrt.f32 %v361_v39 }
  0x50   : > { %2138 = vrsqrt.f32 %v362_v14 }
  0x59   : > { %v2137_v18 = vpop.eup %2136 }
  0x5a   : > { %v2139_v42 = vpop.eup %2138  ;;  %v365_v43 = vmul.f32 %v2137_v18, %v2552_v54  ;;  %v367_v44 = vmul.f32 %v2137_v18, %v2555_v55  ;;  %v371_v15 = vmul.f32 %v2137_v18, %v2561_v57  ;;  %v369_v45 = vmul.f32 %v2137_v18, %v2558_v56 }
  0x5b   : > { %v366_v46 = vmul.f32 %v2139_v42, %v2564_v58  ;;  %v368_v47 = vmul.f32 %v2139_v42, %v2567_v59  ;;  %v372_v48 = vmul.f32 %v2139_v42, %v2573_v61  ;;  %v370_v49 = vmul.f32 %v2139_v42, %v2570_v60 }
  0x5c   : > { %v373_v50 = vmul.f32 %v2137_v18, %v2576_v62  ;;  %v374_v51 = vmul.f32 %v2139_v42, %v2579_v63 }
  0x8f   : > { %v423_v52 = vpop.permute.xlu1 %422  ;;  %v383_v54 = vpop.permute.xlu0 %382 }
  0x90   : > { %v405_v53 = vmul.f32 %v383_v54, %v365_v43  ;;  %v406_v55 = vmul.f32 %v383_v54, %v366_v46 }
  0x92   : > { %v2634_v0 = vadd.f32 %v423_v52, %v405_v53  ;;  %v2636_v57 = vadd.f32 %v423_v52, %v406_v55 }
  0x93   : > { %v428_v56 = vpop.permute.xlu1 %427  ;;  %v388_v58 = vpop.permute.xlu0 %387 }
  0x94   : > { %v407_v1 = vmul.f32 %v388_v58, %v367_v44  ;;  %v408_v59 = vmul.f32 %v388_v58, %v368_v47  ;;  %v1850_v61 = vadd.f32 2.0, %v2636_v57  ;;  %v1891_v60 = vadd.f32 0.2857143, %v2636_v57 }
  0x95   : > { %v1849_v62 = vadd.f32 2.0, %v2634_v0  ;;  %v1890_v63 = vadd.f32 0.2857143, %v2634_v0  ;;  %v1863_v13 = vadd.f32 1.4285715, %v2636_v57  ;;  %v2661_v29 = vadd.f32 -2.0, %v2636_v57 }
  0x96   : > { %v2642_v2 = vadd.f32 %v428_v56, %v407_v1  ;;  %v2644_v8 = vadd.f32 %v428_v56, %v408_v59  ;;  %v604_v10 = vmul.f32 1.75, %v1850_v61  ;;  %v1035_v3 = vmul.f32 1.75, %v1891_v60 }
  0x97   : > { %v398_v4 = vpop.permute.xlu1 %397  ;;  %v393_v5 = vpop.permute.xlu0 %392  ;;  %v603_v6 = vmul.f32 1.75, %v1849_v62  ;;  %v1034_v21 = vmul.f32 1.75, %v1890_v63  ;;  %v2655_v27 = vmul.f32 1.75, %v1863_v13  ;;  %v2658_v28 = vadd.f32 -0.2857143, %v2636_v57 }
  0x98   : > { %v1852_v7 = vadd.f32 2.0, %v2644_v8  ;;  %v614_v16 = vmul.f32 %v604_v10, %v604_v10  ;;  %v1893_v19 = vadd.f32 0.2857143, %v2644_v8  ;;  %v1045_v9 = vmul.f32 %v1035_v3, %v1035_v3 }
  0x99   : > { %v1851_v20 = vadd.f32 2.0, %v2642_v2  ;;  %v1892_v26 = vadd.f32 0.2857143, %v2642_v2  ;;  %v410_v17 = vmul.f32 %v393_v5, %v370_v49  ;;  %v613_v34 = vmul.f32 %v603_v6, %v603_v6 }
  0x9a   : > { %v606_v24 = vmul.f32 1.75, %v1852_v7  ;;  %v624_v25 = vsub.f32 0.0, %v614_v16  ;;  %v1037_v12 = vmul.f32 1.75, %v1893_v19  ;;  %v1055_v32 = vsub.f32 0.0, %v1045_v9 }
  0x9b   : > { %v2650_v22 = vpop.permute.xlu1 %437  ;;  %v2652_v23 = vpop.permute.xlu0 %432  ;;  %v412_v35 = vmul.f32 %v398_v4, %v372_v48  ;;  %v1044_v11 = vmul.f32 %v1034_v21, %v1034_v21  ;;  %v605_v40 = vmul.f32 1.75, %v1851_v20  ;;  %v1036_v41 = vmul.f32 1.75, %v1892_v26 }
  0x9c   : > { %v616_v30 = vmul.f32 %v606_v24, %v606_v24  ;;  %v1047_v31 = vmul.f32 %v1037_v12, %v1037_v12  ;;  %v2664_v36 = vadd.f32 %v2652_v23, %v410_v17  ;;  %v635_v37 = vmul.f32 1.442695, %v624_v25 }
  0x9d   : > { %v2666_v18 = vmul.f32 %v398_v4, %v371_v15  ;;  %v2668_v42 = vmul.f32 %v393_v5, %v369_v45  ;;  %v2671_v46 = vadd.f32 %v2650_v22, %v412_v35  ;;  %v1066_v49 = vmul.f32 1.442695, %v1055_v32 }
  0x9e   : > { %v626_v39 = vsub.f32 0.0, %v616_v30  ;;  %v1057_v14 = vsub.f32 0.0, %v1047_v31  ;;  %v623_v52 = vsub.f32 0.0, %v613_v34  ;;  %2140 = vpow2.f32 %v635_v37 }
  0x9f   : > { %v403_v38 = vpop.permute.xlu0 %402  ;;  %v443_v47 = vpop.permute.xlu1 %442  ;;  %v1054_v55 = vsub.f32 0.0, %v1044_v11  ;;  %v2677_v15 = vmul.f32 %v605_v40, %v605_v40  ;;  %v2679_v45 = vmul.f32 %v1036_v41, %v1036_v41 }
  0xa0   : > { %v413_v43 = vmul.f32 %v403_v38, %v373_v50  ;;  %v414_v44 = vmul.f32 %v403_v38, %v374_v51  ;;  %v639_v48 = vmul.f32 1.442695, %v626_v39  ;;  %v1070_v56 = vmul.f32 1.442695, %v1057_v14 }
  0xa1   : > { %v2682_v50 = vadd.f32 2.0, %v2664_v36  ;;  %v625_v34 = vsub.f32 0.0, %v2677_v15  ;;  %v633_v35 = vmul.f32 1.442695, %v623_v52  ;;  %v1064_v37 = vmul.f32 1.442695, %v1054_v55 }
  0xa2   : > { %v2673_v54 = vadd.f32 %v443_v47, %v413_v43  ;;  %v2675_v53 = vadd.f32 %v443_v47, %v414_v44  ;;  %2142 = vpow2.f32 %v639_v48  ;;  %v1056_v14 = vsub.f32 0.0, %v2679_v45 }
  0xa3   : > { %2144 = vpow2.f32 %v1070_v56 }
  0xa4   : > { %v1857_v51 = vadd.f32 2.0, %v2673_v54  ;;  %v1858_v58 = vadd.f32 2.0, %v2675_v53  ;;  %v1870_v1 = vadd.f32 1.4285715, %v2673_v54  ;;  %v1871_v59 = vadd.f32 1.4285715, %v2675_v53 }
  0xa5   : > { %v1884_v61 = vadd.f32 0.85714287, %v2673_v54  ;;  %v1885_v60 = vadd.f32 0.85714287, %v2675_v53  ;;  %v1898_v62 = vadd.f32 0.2857143, %v2673_v54  ;;  %2146 = vpow2.f32 %v1066_v49 }
  0xa6   : > { %v611_v63 = vmul.f32 1.75, %v1857_v51  ;;  %v612_v10 = vmul.f32 1.75, %v1858_v58  ;;  %v754_v3 = vmul.f32 1.75, %v1870_v1  ;;  %v755_v4 = vmul.f32 1.75, %v1871_v59 }
  0xa7   : > { %v898_v5 = vmul.f32 1.75, %v1884_v61  ;;  %v899_v6 = vmul.f32 1.75, %v1885_v60  ;;  %v1899_v13 = vadd.f32 0.2857143, %v2675_v53  ;;  %v1042_v7 = vmul.f32 1.75, %v1898_v62 }
  0xa8   : > { %v621_v16 = vmul.f32 %v611_v63, %v611_v63  ;;  %v622_v19 = vmul.f32 %v612_v10, %v612_v10  ;;  %v764_v9 = vmul.f32 %v754_v3, %v754_v3  ;;  %v765_v20 = vmul.f32 %v755_v4, %v755_v4  ;;  %v2141_v11 = vpop.eup %2140 }
  0xa9   : > { %v908_v21 = vmul.f32 %v898_v5, %v898_v5  ;;  %v909_v24 = vmul.f32 %v899_v6, %v899_v6  ;;  %v1043_v25 = vmul.f32 1.75, %v1899_v13  ;;  %v1052_v12 = vmul.f32 %v1042_v7, %v1042_v7 }
  0xaa   : > { %v631_v26 = vsub.f32 0.0, %v621_v16  ;;  %v632_v17 = vsub.f32 0.0, %v622_v19  ;;  %v774_v30 = vsub.f32 0.0, %v764_v9  ;;  %v775_v31 = vsub.f32 0.0, %v765_v20 }
  0xab   : > { %v918_v32 = vsub.f32 0.0, %v908_v21  ;;  %v919_v38 = vsub.f32 0.0, %v909_v24  ;;  %v1062_v39 = vsub.f32 0.0, %v1052_v12  ;;  %v1053_v44 = vmul.f32 %v1043_v25, %v1043_v25 }
  0xac   : > { %v649_v40 = vmul.f32 1.442695, %v631_v26  ;;  %v651_v41 = vmul.f32 1.442695, %v632_v17  ;;  %v792_v43 = vmul.f32 1.442695, %v774_v30  ;;  %v2143_v58 = vpop.eup %2142  ;;  %2148 = vpow2.f32 %v633_v35 }
  0xad   : > { %v794_v47 = vmul.f32 1.442695, %v775_v31  ;;  %v936_v48 = vmul.f32 1.442695, %v918_v32  ;;  %v1912_v51 = vadd.f32 -0.2857143, %v2673_v54  ;;  %2150 = vpow2.f32 %v1064_v37  ;;  %v2145_v24 = vpop.eup %2144 }
  0xae   : > { %v1913_v1 = vadd.f32 -0.2857143, %v2675_v53  ;;  %v1926_v52 = vadd.f32 -0.85714287, %v2673_v54  ;;  %v1927_v55 = vadd.f32 -0.85714287, %v2675_v53  ;;  %2152 = vpow2.f32 %v649_v40 }
  0xaf   : > { %v938_v56 = vmul.f32 1.442695, %v919_v38  ;;  %v1186_v59 = vmul.f32 1.75, %v1912_v51  ;;  %v1940_v61 = vadd.f32 -1.4285715, %v2673_v54  ;;  %v1063_v60 = vsub.f32 0.0, %v1053_v44  ;;  %v2147_v32 = vpop.eup %2146 }
  0xb0   : > { %v1187_v62 = vmul.f32 1.75, %v1913_v1  ;;  %v1330_v63 = vmul.f32 1.75, %v1926_v52  ;;  %v1331_v10 = vmul.f32 1.75, %v1927_v55  ;;  %v1941_v49 = vadd.f32 -1.4285715, %v2675_v53 }
  0xb1   : > { %v1196_v3 = vmul.f32 %v1186_v59, %v1186_v59  ;;  %v1474_v4 = vmul.f32 1.75, %v1940_v61  ;;  %2154 = vpow2.f32 %v651_v41  ;;  %v1080_v7 = vmul.f32 1.442695, %v1062_v39 }
  0xb2   : > { %v1197_v5 = vmul.f32 %v1187_v62, %v1187_v62  ;;  %v1340_v6 = vmul.f32 %v1330_v63, %v1330_v63  ;;  %v1341_v13 = vmul.f32 %v1331_v10, %v1331_v10  ;;  %2156 = vpow2.f32 %v792_v43 }
  0xb3   : > { %v1206_v16 = vsub.f32 0.0, %v1196_v3  ;;  %v1475_v19 = vmul.f32 1.75, %v1941_v49  ;;  %2158 = vpow2.f32 %v794_v47  ;;  %v1082_v9 = vmul.f32 1.442695, %v1063_v60 }
  0xb4   : > { %v1207_v20 = vsub.f32 0.0, %v1197_v5  ;;  %v1350_v21 = vsub.f32 0.0, %v1340_v6  ;;  %2160 = vpow2.f32 %v936_v48  ;;  %v1351_v25 = vsub.f32 0.0, %v1341_v13 }
  0xb5   : > { %v1484_v12 = vmul.f32 %v1474_v4, %v1474_v4  ;;  %v1856_v26 = vadd.f32 2.0, %v2671_v46  ;;  %2162 = vpow2.f32 %v938_v56  ;;  %v1224_v17 = vmul.f32 1.442695, %v1206_v16 }
  0xb6   : > { %v1974_v30 = vpack.c.bf16 %v2143_v58, %v2141_v11  ;;  %v608_v31 = vmul.f32 1.75, %v2682_v50  ;;  %v2704_v35 = vadd.f32 %v2650_v22, %v2666_v18  ;;  %2164 = vpow2.f32 %v1080_v7  ;;  %v2706_v39 = vpop.eup %2148 }
  0xb7   : > { %v1226_v37 = vmul.f32 1.442695, %v1207_v20  ;;  %v1485_v38 = vmul.f32 %v1475_v19, %v1475_v19  ;;  %v2710_v40 = vadd.f32 %v2652_v23, %v2668_v42  ;;  %2166 = vpow2.f32 %v1082_v9  ;;  %v2712_v43 = vpop.eup %2150 }
  0xb8   : > { %v1368_v41 = vmul.f32 1.442695, %v1350_v21  ;;  %1975 = vmatprep.subr.bf16.mxu1 %v1974_v30  ;;  %v1998_v11 = vpack.c.bf16 %v2145_v24, %v2147_v32  ;;  %v1370_v50 = vmul.f32 1.442695, %v1351_v25  ;;  %v1494_v44 = vsub.f32 0.0, %v1484_v12  ;;  %v2719_v48 = vpop.eup %2152 }
  0xb9   : > { %v1954_v22 = vadd.f32 -2.0, %v2673_v54  ;;  %v637_v18 = vmul.f32 1.442695, %v625_v34  ;;  %2168 = vpow2.f32 %v1224_v17  ;;  %v1068_v47 = vmul.f32 1.442695, %v1056_v14 }
  0xba   : > { %1999 = vmatprep.subr.bf16.mxu0 %v1998_v11  ;;  %v610_v23 = vmul.f32 1.75, %v1856_v26  ;;  %v618_v42 = vmul.f32 %v608_v31, %v608_v31  ;;  %2170 = vpow2.f32 %v1226_v37  ;;  %v1495_v51 = vsub.f32 0.0, %v1485_v38 }
  0xbb   : > { %v1895_v58 = vadd.f32 0.2857143, %v2664_v36  ;;  %v1897_v1 = vadd.f32 0.2857143, %v2671_v46  ;;  %v2723_v52 = vpop.eup %2154  ;;  %2172 = vpow2.f32 %v1368_v41  ;;  %v1955_v54 = vadd.f32 -2.0, %v2675_v53 }
  0xbc   : > { %v620_v15 = vmul.f32 %v610_v23, %v610_v23  ;;  %v628_v34 = vsub.f32 0.0, %v618_v42  ;;  %v2726_v55 = vpop.eup %2156  ;;  %v2728_v45 = vmul.f32 1.442695, %v1494_v44  ;;  %2174 = vpow2.f32 %v637_v18 }
  0xbd   : > { %v1039_v14 = vmul.f32 1.75, %v1895_v58  ;;  %v1041_v56 = vmul.f32 1.75, %v1897_v1  ;;  %v2730_v59 = vpop.eup %2158  ;;  %v2732_v61 = vmul.f32 1.75, %v1954_v22  ;;  %2176 = vpow2.f32 %v1068_v47 }
  0xbe   : > { %v630_v60 = vsub.f32 0.0, %v620_v15  ;;  %v643_v62 = vmul.f32 1.442695, %v628_v34  ;;  %v2734_v63 = vpop.eup %2160  ;;  %v2736_v10 = vmul.f32 1.442695, %v1495_v51  ;;  %v1853_v49 = vadd.f32 2.0, %v2710_v40 }
  0xbf   : > { %v1049_v53 = vmul.f32 %v1039_v14, %v1039_v14  ;;  %v1051_v3 = vmul.f32 %v1041_v56, %v1041_v56  ;;  %v2739_v4 = vpop.eup %2162  ;;  %v2741_v5 = vmul.f32 1.75, %v1955_v54  ;;  %v1855_v13 = vadd.f32 2.0, %v2704_v35 }
  0xc0   : > { %v647_v6 = vmul.f32 1.442695, %v630_v60  ;;  %v1894_v7 = vadd.f32 0.2857143, %v2710_v40  ;;  %v2745_v16 = vpop.eup %2164  ;;  %2178 = vpow2.f32 %v1370_v50  ;;  %v607_v20 = vmul.f32 1.75, %v1853_v49 }
  0xc1   : > { %v1059_v19 = vsub.f32 0.0, %v1049_v53  ;;  %v1061_v9 = vsub.f32 0.0, %v1051_v3  ;;  %v2747_v21 = vpop.eup %2166  ;;  %2180 = vpow2.f32 %v643_v62  ;;  %v609_v24 = vmul.f32 1.75, %v1855_v13 }
  0xc2   : > { %v1896_v25 = vadd.f32 0.2857143, %v2704_v35  ;;  %v1038_v12 = vmul.f32 1.75, %v1894_v7  ;;  %2182 = vpow2.f32 %v647_v6  ;;  %v617_v30 = vmul.f32 %v607_v20, %v607_v20 }
  0xc3   : > { %v1074_v26 = vmul.f32 1.442695, %v1059_v19  ;;  %v1078_v17 = vmul.f32 1.442695, %v1061_v9  ;;  %v2750_v31 = vpop.eup %2168  ;;  %v619_v32 = vmul.f32 %v609_v24, %v609_v24  ;;  %v1865_v41 = vadd.f32 1.4285715, %v2644_v8 }
  0xc4   : > { %v1040_v37 = vmul.f32 1.75, %v1896_v25  ;;  %v1048_v38 = vmul.f32 %v1038_v12, %v1038_v12  ;;  %v2753_v11 = vpop.eup %2170  ;;  %v627_v50 = vsub.f32 0.0, %v617_v30  ;;  %v757_v44 = vmul.f32 %v2655_v27, %v2655_v27 }
  0xc5   : > { %2184 = vpow2.f32 %v1074_v26  ;;  %v1907_v22 = vadd.f32 -0.2857143, %v2644_v8  ;;  %v2758_v18 = vpop.eup %2172  ;;  %v629_v47 = vsub.f32 0.0, %v619_v32  ;;  %v749_v1 = vmul.f32 1.75, %v1865_v41 }
  0xc6   : > { %2186 = vpow2.f32 %v1078_v17  ;;  %v1050_v23 = vmul.f32 %v1040_v37, %v1040_v37  ;;  %v1058_v42 = vsub.f32 0.0, %v1048_v38  ;;  %v2175_v51 = vpop.eup %2174  ;;  %v641_v58 = vmul.f32 1.442695, %v627_v50 }
  0xc7   : > { %v767_v54 = vsub.f32 0.0, %v757_v44  ;;  %v1179_v15 = vmul.f32 1.75, %v2658_v28  ;;  %v2177_v34 = vpop.eup %2176  ;;  %v1976_v14 = vpack.c.bf16 %v2175_v51, %v2706_v39  ;;  %v645_v56 = vmul.f32 1.442695, %v629_v47 }
  0xc8   : > { %v1060_v60 = vsub.f32 0.0, %v1050_v23  ;;  %v1072_v27 = vmul.f32 1.442695, %v1058_v42  ;;  %v2000_v62 = vpack.c.bf16 %v2177_v34, %v2712_v43  ;;  %2188 = vpow2.f32 %v641_v58 }
  0xc9   : > { %v759_v53 = vmul.f32 %v749_v1, %v749_v1  ;;  %v778_v3 = vmul.f32 1.442695, %v767_v54  ;;  %1977 = vmatpush1.bf16.msra.mxu1 %v1976_v14  ;;  %2190 = vpow2.f32 %v645_v56  ;;  %v1181_v6 = vmul.f32 1.75, %v1907_v22 }
  0xca   : > { %v1076_v49 = vmul.f32 1.442695, %v1060_v60  ;;  %v1189_v13 = vmul.f32 %v1179_v15, %v1179_v15  ;;  %v2763_v7 = vpop.eup %2178  ;;  %2001 = vmatpush1.bf16.msra.mxu0 %v2000_v62  ;;  %2192 = vpow2.f32 %v1072_v27  ;;  %v1862_v39 = vadd.f32 1.4285715, %v2634_v0 }
  0xcb   : > { %v769_v28 = vsub.f32 0.0, %v759_v53  ;;  %v1864_v19 = vadd.f32 1.4285715, %v2642_v2  ;;  %v2181_v9 = vpop.eup %2180  ;;  %v1191_v43 = vmul.f32 %v1181_v6, %v1181_v6  ;;  %v1904_v24 = vadd.f32 -0.2857143, %v2634_v0 }
  0xcc   : > { %2194 = vpow2.f32 %v1076_v49  ;;  %v1199_v20 = vsub.f32 0.0, %v1189_v13  ;;  %v2183_v25 = vpop.eup %2182  ;;  %v746_v26 = vmul.f32 1.75, %v1862_v39  ;;  %v1906_v38 = vadd.f32 -0.2857143, %v2642_v2 }
  0xcd   : > { %2196 = vpow2.f32 %v778_v3  ;;  %v782_v12 = vmul.f32 1.442695, %v769_v28  ;;  %v748_v17 = vmul.f32 1.75, %v1864_v19  ;;  %v1978_v30 = vpack.c.bf16 %v2183_v25, %v2181_v9 }
  0xce   : > { %v1201_v32 = vsub.f32 0.0, %v1191_v43  ;;  %v1210_v37 = vmul.f32 1.442695, %v1199_v20  ;;  %v756_v50 = vmul.f32 %v746_v26, %v746_v26  ;;  %v1178_v22 = vmul.f32 1.75, %v1904_v24 }
  0xcf   : > { %v2185_v41 = vpop.eup %2184  ;;  %2198 = vpow2.f32 %v782_v12  ;;  %v758_v44 = vmul.f32 %v748_v17, %v748_v17  ;;  %1979 = vmatprep.subr.bf16.mxu1 %v1978_v30  ;;  %v1180_v42 = vmul.f32 1.75, %v1906_v38  ;;  %v1867_v51 = vadd.f32 1.4285715, %v2664_v36 }
  0xd0   : > { %v2187_v47 = vpop.eup %2186  ;;  %2200 = vpow2.f32 %v1210_v37  ;;  %v1214_v23 = vmul.f32 1.442695, %v1201_v32  ;;  %v766_v1 = vsub.f32 0.0, %v756_v50  ;;  %v1188_v15 = vmul.f32 %v1178_v22, %v1178_v22  ;;  %v653_v22 = vld [vmem:[%s2949_s3] sm:$0xff] }
  0xd1   : > { %v2002_v58 = vpack.c.bf16 %v2187_v47, %v2185_v41  ;;  %v768_v54 = vsub.f32 0.0, %v758_v44  ;;  %v1190_v34 = vmul.f32 %v1180_v42, %v1180_v42  ;;  %v1869_v14 = vadd.f32 1.4285715, %v2671_v46 }
  0xd2   : > { %2202 = vpow2.f32 %v1214_v23  ;;  %v751_v56 = vmul.f32 1.75, %v1867_v51  ;;  %v2189_v60 = vpop.eup %2188  ;;  %v776_v27 = vmul.f32 1.442695, %v766_v1  ;;  %v1198_v53 = vsub.f32 0.0, %v1188_v15  ;;  %v1900_v15 = vld [vmem:[%s2949_s3 + $0x18] sm:$0xff] }
  0xd3   : > { %2003 = vmatprep.subr.bf16.mxu0 %v2002_v58  ;;  %v780_v62 = vmul.f32 1.442695, %v768_v54  ;;  %v2772_v3 = vadd.f32 -2.0, %v2644_v8  ;;  %v2191_v49 = vpop.eup %2190  ;;  %v1200_v6 = vsub.f32 0.0, %v1190_v34  ;;  %v753_v13 = vmul.f32 1.75, %v1869_v14 }
  0xd4   : > { %v761_v28 = vmul.f32 %v751_v56, %v751_v56  ;;  %v1909_v39 = vadd.f32 -0.2857143, %v2664_v36  ;;  %v2193_v19 = vpop.eup %2192  ;;  %v1980_v9 = vpack.c.bf16 %v2191_v49, %v2189_v60  ;;  %2204 = vpow2.f32 %v776_v27 }
  0xd5   : > { %v1208_v43 = vmul.f32 1.442695, %v1198_v53  ;;  %v1911_v20 = vadd.f32 -0.2857143, %v2671_v46  ;;  %2206 = vpow2.f32 %v780_v62  ;;  %v1212_v25 = vmul.f32 1.442695, %v1200_v6 }
  0xd6   : > { %v2195_v24 = vpop.eup %2194  ;;  %v763_v12 = vmul.f32 %v753_v13, %v753_v13  ;;  %v771_v26 = vsub.f32 0.0, %v761_v28  ;;  %1981 = vmatpush1.bf16.msra.mxu1 %v1980_v9  ;;  %v1183_v32 = vmul.f32 1.75, %v1909_v39  ;;  %v1866_v50 = vadd.f32 1.4285715, %v2710_v40 }
  0xd7   : > { %v2197_v17 = vpop.eup %2196  ;;  %v2004_v30 = vpack.c.bf16 %v2195_v24, %v2193_v19  ;;  %2208 = vpow2.f32 %v1208_v43  ;;  %v1185_v37 = vmul.f32 1.75, %v1911_v20  ;;  %1859 = vmatprep.subr.msk.mxu1 %vm294_vm0, %v2723_v52  ;;  %v1868_v42 = vadd.f32 1.4285715, %v2704_v35 }
  0xd8   : > { %2210 = vpow2.f32 %v1212_v25  ;;  %v773_v38 = vsub.f32 0.0, %v763_v12  ;;  %v786_v41 = vmul.f32 1.442695, %v771_v26  ;;  %v1193_v47 = vmul.f32 %v1183_v32, %v1183_v32 }
  0xd9   : > { %v2199_v44 = vpop.eup %2198  ;;  %2005 = vmatpush1.bf16.msra.mxu0 %v2004_v30  ;;  %v1195_v23 = vmul.f32 %v1185_v37, %v1185_v37  ;;  %v1908_v51 = vadd.f32 -0.2857143, %v2710_v40  ;;  %v750_v54 = vmul.f32 1.75, %v1866_v50  ;;  %v752_v56 = vmul.f32 1.75, %v1868_v42 }
  0xda   : > { %v2201_v58 = vpop.eup %2200  ;;  %1901 = vmatprep.subr.msk.mxu0 %vm294_vm0, %v2747_v21  ;;  %v1982_v52 = vpack.c.bf16 %v2199_v44, %v2197_v17  ;;  %2212 = vpow2.f32 %v786_v41  ;;  %v790_v1 = vmul.f32 1.442695, %v773_v38  ;;  %1860 = vmatpush1.msk.msra.mxu1 %vm294_vm0, %v2719_v48  ;;  %v1203_v34 = vsub.f32 0.0, %v1193_v47 }
  0xdb   : > { %v1205_v14 = vsub.f32 0.0, %v1195_v23  ;;  %v1910_v60 = vadd.f32 -0.2857143, %v2704_v35  ;;  %1861 = vmatmul.mubr.msk.f32.vlgmr.msra.gmra.mrb[0].mxu1 %vm512_vm1, %v653_v22  ;;  %v760_v21 = vmul.f32 %v750_v54, %v750_v54  ;;  %v1182_v62 = vmul.f32 1.75, %v1908_v51 }
  0xdc   : > { %v2203_v27 = vpop.eup %2202  ;;  %1983 = vmatprep.subr.bf16.mxu1 %v1982_v52  ;;  %2214 = vpow2.f32 %v790_v1  ;;  %v1877_v53 = vadd.f32 0.85714287, %v2636_v57  ;;  %v1218_v49 = vmul.f32 1.442695, %v1203_v34  ;;  %v762_v13 = vmul.f32 %v752_v56, %v752_v56  ;;  %871 = vmatprep.mubr.f32.mxu1 %v2381_v33 }
  0xdd   : > { %1902 = vmatpush1.msk.msra.mxu0 %vm294_vm0, %v2745_v16  ;;  %v2006_v48 = vpack.c.bf16 %v2203_v27, %v2201_v58  ;;  %v1222_v6 = vmul.f32 1.442695, %v1205_v14  ;;  %v770_v28 = vsub.f32 0.0, %v760_v21  ;;  %v1184_v39 = vmul.f32 1.75, %v1910_v60 }
  0xde   : > { %1903 = vmatmul.mubr.msk.f32.vlgmr.msra.gmra.mrb[0].mxu0 %vm512_vm1, %v1900_v15  ;;  %v1192_v19 = vmul.f32 %v1182_v62, %v1182_v62  ;;  %v1879_v9 = vadd.f32 0.85714287, %v2644_v8  ;;  %v2205_v43 = vpop.eup %2204  ;;  %2216 = vpow2.f32 %v1218_v49  ;;  %v772_v20 = vsub.f32 0.0, %v762_v13 }
  0xdf   : > { %2007 = vmatprep.subr.bf16.mxu0 %v2006_v48  ;;  %v891_v24 = vmul.f32 1.75, %v1877_v53  ;;  %1303 = vmatprep.mubr.f32.mxu0 %v2381_v33  ;;  %v1919_v16 = vadd.f32 -0.85714287, %v2636_v57  ;;  %v2207_v25 = vpop.eup %2206  ;;  %2218 = vpow2.f32 %v1222_v6  ;;  %v784_v12 = vmul.f32 1.442695, %v770_v28 }
  0xe0   : > { %v1194_v26 = vmul.f32 %v1184_v39, %v1184_v39  ;;  %v1202_v17 = vsub.f32 0.0, %v1192_v19  ;;  %v1984_v32 = vpack.c.bf16 %v2207_v25, %v2205_v43  ;;  %v788_v37 = vmul.f32 1.442695, %v772_v20 }
  0xe1   : > { %v2209_v30 = vpop.eup %2208  ;;  %v893_v38 = vmul.f32 1.75, %v1879_v9  ;;  %v901_v41 = vmul.f32 %v891_v24, %v891_v24  ;;  %2220 = vpow2.f32 %v784_v12  ;;  %v1921_v47 = vadd.f32 -0.85714287, %v2644_v8 }
  0xe2   : > { %v2211_v50 = vpop.eup %2210  ;;  %v1204_v44 = vsub.f32 0.0, %v1194_v26  ;;  %v1216_v22 = vmul.f32 1.442695, %v1202_v17  ;;  %1985 = vmatpush1.bf16.msra.mxu1 %v1984_v32  ;;  %2222 = vpow2.f32 %v788_v37  ;;  %v1323_v1 = vmul.f32 1.75, %v1919_v16 }
  0xe3   : > { %v2008_v23 = vpack.c.bf16 %v2211_v50, %v2209_v30  ;;  %v903_v42 = vmul.f32 %v893_v38, %v893_v38  ;;  %v911_v51 = vsub.f32 0.0, %v901_v41  ;;  %v1325_v54 = vmul.f32 1.75, %v1921_v47 }
  0xe4   : > { %v2213_v58 = vpop.eup %2212  ;;  %2224 = vpow2.f32 %v1216_v22  ;;  %v1220_v52 = vmul.f32 1.442695, %v1204_v44  ;;  %v1876_v14 = vadd.f32 0.85714287, %v2634_v0  ;;  %v2804_v56 = vmul.f32 1.75, %v2661_v29 }
  0xe5   : > { %2009 = vmatpush1.bf16.msra.mxu0 %v2008_v23  ;;  %v913_v15 = vsub.f32 0.0, %v903_v42  ;;  %v922_v34 = vmul.f32 1.442695, %v911_v51  ;;  %v1333_v27 = vmul.f32 %v1323_v1, %v1323_v1  ;;  %v1335_v21 = vmul.f32 %v1325_v54, %v1325_v54 }
  0xe6   : > { %v2215_v60 = vpop.eup %2214  ;;  %2226 = vpow2.f32 %v1220_v52  ;;  %v1878_v62 = vadd.f32 0.85714287, %v2642_v2  ;;  %v890_v49 = vmul.f32 1.75, %v1876_v14  ;;  %v1918_v39 = vadd.f32 -0.85714287, %v2634_v0 }
  0xe7   : > { %v1986_v53 = vpack.c.bf16 %v2215_v60, %v2213_v58  ;;  %2228 = vpow2.f32 %v922_v34  ;;  %v926_v48 = vmul.f32 1.442695, %v913_v15  ;;  %v1343_v6 = vsub.f32 0.0, %v1333_v27 }
  0xe8   : > { %v1345_v13 = vsub.f32 0.0, %v1335_v21  ;;  %v892_v28 = vmul.f32 1.75, %v1878_v62  ;;  %v2217_v19 = vpop.eup %2216  ;;  %v900_v29 = vmul.f32 %v890_v49, %v890_v49  ;;  %v1920_v9 = vadd.f32 -0.85714287, %v2642_v2 }
  0xe9   : > { %1987 = vmatprep.subr.bf16.mxu1 %v1986_v53  ;;  %2230 = vpow2.f32 %v926_v48  ;;  %v1881_v43 = vadd.f32 0.85714287, %v2664_v36  ;;  %v2219_v20 = vpop.eup %2218  ;;  %v1354_v24 = vmul.f32 1.442695, %v1343_v6  ;;  %v1322_v12 = vmul.f32 1.75, %v1918_v39 }
  0xea   : > { %v1358_v16 = vmul.f32 1.442695, %v1345_v13  ;;  %v902_v25 = vmul.f32 %v892_v28, %v892_v28  ;;  %v2010_v26 = vpack.c.bf16 %v2219_v20, %v2217_v19  ;;  %v910_v17 = vsub.f32 0.0, %v900_v29  ;;  %v1872_v13 = vld [vmem:[%s2949_s3 + $0x8] sm:$0xff] }
  0xeb   : > { %v1324_v30 = vmul.f32 1.75, %v1920_v9  ;;  %v1883_v32 = vadd.f32 0.85714287, %v2671_v46  ;;  %v2221_v37 = vpop.eup %2220  ;;  %2232 = vpow2.f32 %v1354_v24  ;;  %v1332_v41 = vmul.f32 %v1322_v12, %v1322_v12 }
  0xec   : > { %v912_v38 = vsub.f32 0.0, %v902_v25  ;;  %v895_v50 = vmul.f32 1.75, %v1881_v43  ;;  %v2223_v44 = vpop.eup %2222  ;;  %2011 = vmatprep.subr.bf16.mxu0 %v2010_v26  ;;  %2234 = vpow2.f32 %v1358_v16  ;;  %v920_v22 = vmul.f32 1.442695, %v910_v17  ;;  %v1914_v25 = vld [vmem:[%s2949_s3 + $0x20] sm:$0xff] }
  0xed   : > { %v1334_v47 = vmul.f32 %v1324_v30, %v1324_v30  ;;  %v897_v23 = vmul.f32 1.75, %v1883_v32  ;;  %v1988_v51 = vpack.c.bf16 %v2223_v44, %v2221_v37  ;;  %v1342_v52 = vsub.f32 0.0, %v1332_v41 }
  0xee   : > { %v2225_v42 = vpop.eup %2224  ;;  %v924_v58 = vmul.f32 1.442695, %v912_v38  ;;  %v905_v1 = vmul.f32 %v895_v50, %v895_v50  ;;  %2236 = vpow2.f32 %v920_v22  ;;  %v1923_v34 = vadd.f32 -0.85714287, %v2664_v36 }
  0xef   : > { %v1344_v54 = vsub.f32 0.0, %v1334_v47  ;;  %v907_v15 = vmul.f32 %v897_v23, %v897_v23  ;;  %1989 = vmatpush1.bf16.msra.mxu1 %v1988_v51  ;;  %v1352_v60 = vmul.f32 1.442695, %v1342_v52  ;;  %v1925_v21 = vadd.f32 -0.85714287, %v2671_v46 }
  0xf0   : > { %v2227_v14 = vpop.eup %2226  ;;  %2238 = vpow2.f32 %v924_v58  ;;  %v915_v27 = vsub.f32 0.0, %v905_v1  ;;  %1873 = vmatprep.subr.msk.mxu1 %vm294_vm0, %v2730_v59  ;;  %v1327_v6 = vmul.f32 1.75, %v1923_v34  ;;  %v1880_v19 = vadd.f32 0.85714287, %v2710_v40 }
  0xf1   : > { %v2229_v62 = vpop.eup %2228  ;;  %v2012_v53 = vpack.c.bf16 %v2227_v14, %v2225_v42  ;;  %v1356_v48 = vmul.f32 1.442695, %v1344_v54  ;;  %v917_v49 = vsub.f32 0.0, %v907_v15  ;;  %2240 = vpow2.f32 %v1352_v60 }
  0xf2   : > { %v930_v28 = vmul.f32 1.442695, %v915_v27  ;;  %v1329_v39 = vmul.f32 1.75, %v1925_v21  ;;  %v1337_v43 = vmul.f32 %v1327_v6, %v1327_v6  ;;  %v1882_v20 = vadd.f32 0.85714287, %v2704_v35 }
  0xf3   : > { %v2231_v29 = vpop.eup %2230  ;;  %2013 = vmatpush1.bf16.msra.mxu0 %v2012_v53  ;;  %2242 = vpow2.f32 %v1356_v48  ;;  %v934_v9 = vmul.f32 1.442695, %v917_v49  ;;  %1874 = vmatpush1.msk.msra.mxu1 %vm294_vm0, %v2726_v55  ;;  %v894_v16 = vmul.f32 1.75, %v1880_v19  ;;  %v1922_v17 = vadd.f32 -0.85714287, %v2710_v40 }
  0xf4   : > { %1915 = vmatprep.subr.msk.mxu0 %vm294_vm0, %v2753_v11  ;;  %v1990_v59 = vpack.c.bf16 %v2231_v29, %v2229_v62  ;;  %2244 = vpow2.f32 %v930_v28  ;;  %v1339_v24 = vmul.f32 %v1329_v39, %v1329_v39  ;;  %1875 = vmatmul.mubr.msk.f32.vlgmr.msra.gmra.mrb[0].mxu1 %vm512_vm1, %v1872_v13  ;;  %v1347_v12 = vsub.f32 0.0, %v1337_v43 }
  0xf5   : > { %2246 = vpow2.f32 %v934_v9  ;;  %v896_v26 = vmul.f32 1.75, %v1882_v20  ;;  %v2233_v30 = vpop.eup %2232  ;;  %v904_v32 = vmul.f32 %v894_v16, %v894_v16  ;;  %v1924_v55 = vadd.f32 -0.85714287, %v2704_v35  ;;  %1015 = vmatprep.mubr.f32.mxu1 %v2381_v33 }
  0xf6   : > { %1991 = vmatprep.subr.bf16.mxu1 %v1990_v59  ;;  %v1349_v11 = vsub.f32 0.0, %v1339_v24  ;;  %v1933_v37 = vadd.f32 -1.4285715, %v2636_v57  ;;  %v2235_v38 = vpop.eup %2234  ;;  %v1362_v41 = vmul.f32 1.442695, %v1347_v12  ;;  %v1326_v44 = vmul.f32 1.75, %v1922_v17 }
  0xf7   : > { %1916 = vmatpush1.msk.msra.mxu0 %vm294_vm0, %v2750_v31  ;;  %v906_v50 = vmul.f32 %v896_v26, %v896_v26  ;;  %v1935_v22 = vadd.f32 -1.4285715, %v2644_v8  ;;  %v2014_v47 = vpack.c.bf16 %v2235_v38, %v2233_v30  ;;  %v914_v42 = vsub.f32 0.0, %v904_v32 }
  0xf8   : > { %1917 = vmatmul.mubr.msk.f32.vlgmr.msra.gmra.mrb[0].mxu0 %vm512_vm1, %v1914_v25  ;;  %v1366_v23 = vmul.f32 1.442695, %v1349_v11  ;;  %v1328_v51 = vmul.f32 1.75, %v1924_v55  ;;  %v2237_v58 = vpop.eup %2236  ;;  %2248 = vpow2.f32 %v1362_v41  ;;  %v1336_v1 = vmul.f32 %v1326_v44, %v1326_v44 }
  0xf9   : > { %v916_v52 = vsub.f32 0.0, %v906_v50  ;;  %1447 = vmatprep.mubr.f32.mxu0 %v2381_v33  ;;  %v1467_v57 = vmul.f32 1.75, %v1933_v37  ;;  %2015 = vmatprep.subr.bf16.mxu0 %v2014_v47  ;;  %v928_v31 = vmul.f32 1.442695, %v914_v42  ;;  %v1469_v34 = vmul.f32 1.75, %v1935_v22 }
  0xfa   : > { %v2239_v54 = vpop.eup %2238  ;;  %2250 = vpow2.f32 %v1366_v23  ;;  %v1338_v15 = vmul.f32 %v1328_v51, %v1328_v51  ;;  %v1346_v60 = vsub.f32 0.0, %v1336_v1  ;;  %v1932_v48 = vadd.f32 -1.4285715, %v2634_v0 }
  0xfb   : > { %v1992_v8 = vpack.c.bf16 %v2239_v54, %v2237_v58  ;;  %v932_v14 = vmul.f32 1.442695, %v916_v52  ;;  %v1477_v27 = vmul.f32 %v1467_v57, %v1467_v57  ;;  %v2241_v21 = vpop.eup %2240  ;;  %2252 = vpow2.f32 %v928_v31 }
  0xfc   : > { %v1348_v62 = vsub.f32 0.0, %v1338_v15  ;;  %v1479_v53 = vmul.f32 %v1469_v34, %v1469_v34  ;;  %v1360_v6 = vmul.f32 1.442695, %v1346_v60  ;;  %v1934_v28 = vadd.f32 -1.4285715, %v2642_v2 }
  0xfd   : > { %v2243_v49 = vpop.eup %2242  ;;  %1993 = vmatpush1.bf16.msra.mxu1 %v1992_v8  ;;  %2254 = vpow2.f32 %v932_v14  ;;  %v1487_v13 = vsub.f32 0.0, %v1477_v27  ;;  %v1466_v43 = vmul.f32 1.75, %v1932_v48  ;;  %v1937_v16 = vadd.f32 -1.4285715, %v2664_v36 }
  0xfe   : > { %v2245_v39 = vpop.eup %2244  ;;  %v2016_v19 = vpack.c.bf16 %v2243_v49, %v2241_v21  ;;  %v1364_v29 = vmul.f32 1.442695, %v1348_v62  ;;  %v1489_v9 = vsub.f32 0.0, %v1479_v53  ;;  %2256 = vpow2.f32 %v1360_v6 }
  0xff   : > { %v2247_v20 = vpop.eup %2246  ;;  %v1498_v59 = vmul.f32 1.442695, %v1487_v13  ;;  %v1468_v24 = vmul.f32 1.75, %v1934_v28  ;;  %v1476_v26 = vmul.f32 %v1466_v43, %v1466_v43  ;;  %v1939_v30 = vadd.f32 -1.4285715, %v2671_v46 }
 0x100   : > { %2017 = vmatpush1.bf16.msra.mxu0 %v2016_v19  ;;  %v1994_v25 = vpack.c.bf16 %v2247_v20, %v2245_v39  ;;  %2258 = vpow2.f32 %v1364_v29  ;;  %v1502_v12 = vmul.f32 1.442695, %v1489_v9  ;;  %v1471_v11 = vmul.f32 1.75, %v1937_v16 }
 0x101   : > { %2260 = vpow2.f32 %v1498_v59  ;;  %v1478_v17 = vmul.f32 %v1468_v24, %v1468_v24  ;;  %v1486_v32 = vsub.f32 0.0, %v1476_v26  ;;  %v1936_v55 = vadd.f32 -1.4285715, %v2710_v40 }
 0x102   : > { %1995 = vmatprep.subr.bf16.mxu1 %v1994_v25  ;;  %2262 = vpow2.f32 %v1502_v12  ;;  %v1938_v37 = vadd.f32 -1.4285715, %v2704_v35  ;;  %v2249_v38 = vpop.eup %2248  ;;  %v1473_v50 = vmul.f32 1.75, %v1939_v30  ;;  %v1481_v44 = vmul.f32 %v1471_v11, %v1471_v11 }
 0x103   : > { %v1488_v41 = vsub.f32 0.0, %v1478_v17  ;;  %v1613_v22 = vmul.f32 1.75, %v2772_v3  ;;  %v1496_v23 = vmul.f32 1.442695, %v1486_v32  ;;  %v1470_v42 = vmul.f32 1.75, %v1936_v55 }
 0x104   : > { %v2251_v47 = vpop.eup %2250  ;;  %v1472_v51 = vmul.f32 1.75, %v1938_v37  ;;  %v1621_v58 = vmul.f32 %v2804_v56, %v2804_v56  ;;  %v1483_v57 = vmul.f32 %v1473_v50, %v1473_v50  ;;  %v1491_v54 = vsub.f32 0.0, %v1481_v44 }
 0x105   : > { %v2018_v52 = vpack.c.bf16 %v2251_v47, %v2249_v38  ;;  %v1500_v1 = vmul.f32 1.442695, %v1488_v41  ;;  %v2253_v31 = vpop.eup %2252  ;;  %2264 = vpow2.f32 %v1496_v23  ;;  %v1480_v15 = vmul.f32 %v1470_v42, %v1470_v42 }
 0x106   : > { %v1482_v34 = vmul.f32 %v1472_v51, %v1472_v51  ;;  %v1623_v8 = vmul.f32 %v1613_v22, %v1613_v22  ;;  %v2848_v3 = vmul.f32 %v2732_v61, %v2732_v61  ;;  %v1493_v60 = vsub.f32 0.0, %v1483_v57 }
 0x107   : > { %v2255_v14 = vpop.eup %2254  ;;  %2019 = vmatprep.subr.bf16.mxu0 %v2018_v52  ;;  %2266 = vpow2.f32 %v1500_v1  ;;  %v1506_v27 = vmul.f32 1.442695, %v1491_v54  ;;  %v1490_v56 = vsub.f32 0.0, %v1480_v15  ;;  %v1631_v6 = vsub.f32 0.0, %v1621_v58 }
 0x108   : > { %v1996_v21 = vpack.c.bf16 %v2255_v14, %v2253_v31  ;;  %v1492_v62 = vsub.f32 0.0, %v1482_v34  ;;  %v1633_v53 = vsub.f32 0.0, %v1623_v8  ;;  %v2257_v48 = vpop.eup %2256  ;;  %v1510_v49 = vmul.f32 1.442695, %v1493_v60 }
 0x109   : > { %2268 = vpow2.f32 %v1506_v27  ;;  %v1946_v13 = vadd.f32 -2.0, %v2634_v0  ;;  %v2853_v39 = vmul.f32 %v2741_v5, %v2741_v5  ;;  %v1504_v61 = vmul.f32 1.442695, %v1490_v56  ;;  %v1886_v0 = vld [vmem:[%s2949_s3 + $0x10] sm:$0xff] }
 0x10a   : > { %v2259_v28 = vpop.eup %2258  ;;  %1997 = vmatpush1.bf16.msra.mxu1 %v1996_v21  ;;  %v1508_v19 = vmul.f32 1.442695, %v1492_v62  ;;  %v1646_v29 = vmul.f32 1.442695, %v1633_v53  ;;  %2270 = vpow2.f32 %v1510_v49  ;;  %v1948_v20 = vadd.f32 -2.0, %v2642_v2  ;;  %v1942_v53 = vld [vmem:[%s2949_s3 + $0x30] sm:$0xff] }
 0x10b   : > { %v2261_v9 = vpop.eup %2260  ;;  %v2020_v43 = vpack.c.bf16 %v2259_v28, %v2257_v48  ;;  %1887 = vmatprep.subr.msk.mxu1 %vm294_vm0, %v2739_v4  ;;  %v1610_v59 = vmul.f32 1.75, %v1946_v13  ;;  %2272 = vpow2.f32 %v1504_v61  ;;  %v1951_v5 = vadd.f32 -2.0, %v2664_v36 }
 0x10c   : > { %v2263_v24 = vpop.eup %2262  ;;  %v1953_v16 = vadd.f32 -2.0, %v2671_v46  ;;  %v1950_v25 = vadd.f32 -2.0, %v2710_v40  ;;  %2274 = vpow2.f32 %v1508_v19  ;;  %v1642_v12 = vmul.f32 1.442695, %v1631_v6  ;;  %v1928_v40 = vld [vmem:[%s2949_s3 + $0x28] sm:$0xff] }
 0x10d   : > { %2021 = vmatpush1.bf16.msra.mxu0 %v2020_v43  ;;  %v1612_v4 = vmul.f32 1.75, %v1948_v20  ;;  %v1620_v26 = vmul.f32 %v1610_v59, %v1610_v59  ;;  %2276 = vpow2.f32 %v2736_v10  ;;  %v1615_v2 = vmul.f32 1.75, %v1951_v5  ;;  %v1956_v20 = vld [vmem:[%s2949_s3 + $0x38] sm:$0xff] }
 0x10e   : > { %1929 = vmatprep.subr.msk.mxu0 %vm294_vm0, %v2763_v7  ;;  %1888 = vmatpush1.msk.msra.mxu1 %vm294_vm0, %v2734_v63  ;;  %v1617_v17 = vmul.f32 1.75, %v1953_v16  ;;  %v1952_v36 = vadd.f32 -2.0, %v2704_v35  ;;  %v2022_v46 = vpack.c.bf16 %v2263_v24, %v2261_v9  ;;  %v1614_v10 = vmul.f32 1.75, %v1950_v25 }
 0x10f   : > { %1889 = vmatmul.mubr.msk.f32.vlgmr.msra.gmra.mrb[0].mxu1 %vm512_vm1, %v1886_v0  ;;  %v1622_v30 = vmul.f32 %v1612_v4, %v1612_v4  ;;  %v1630_v11 = vsub.f32 0.0, %v1620_v26  ;;  %v2265_v32 = vpop.eup %2264  ;;  %2278 = vpow2.f32 %v1646_v29  ;;  %v1625_v7 = vmul.f32 %v1615_v2, %v1615_v2  ;;  %v510_v0 = vpop.permute.xlu0 %509 }
 0x110   : > { %v1627_v55 = vmul.f32 %v1617_v17, %v1617_v17  ;;  %v1616_v37 = vmul.f32 1.75, %v1952_v36  ;;  %2280 = vpow2.f32 %v1642_v12  ;;  %v1624_v41 = vmul.f32 %v1614_v10, %v1614_v10 }
 0x111   : > { %v2267_v63 = vpop.eup %2266  ;;  %1930 = vmatpush1.msk.msra.mxu0 %vm294_vm0, %v2758_v18  ;;  %v1632_v35 = vsub.f32 0.0, %v1622_v30  ;;  %v1640_v38 = vmul.f32 1.442695, %v1630_v11  ;;  %v1635_v44 = vsub.f32 0.0, %v1625_v7  ;;  %2282 = vpow2.f32 %v2728_v45 }
 0x112   : > { %2023 = vmatprep.subr.bf16.mxu0 %v2022_v46  ;;  %1931 = vmatmul.mubr.msk.f32.vlgmr.msra.gmra.mrb[0].mxu0 %vm512_vm1, %v1928_v40  ;;  %v2024_v50 = vpack.c.bf16 %v2267_v63, %v2265_v32  ;;  %v1637_v22 = vsub.f32 0.0, %v1627_v55  ;;  %v1626_v47 = vmul.f32 %v1616_v37, %v1616_v37  ;;  %v1639_v42 = vsub.f32 0.0, %v2853_v39 }
 0x113   : > { %v2269_v23 = vpop.eup %2268  ;;  %1591 = vmatprep.mubr.f32.mxu0 %v2381_v33  ;;  %v1644_v51 = vmul.f32 1.442695, %v1632_v35  ;;  %v1634_v18 = vsub.f32 0.0, %v1624_v41  ;;  %2284 = vpow2.f32 %v1640_v38  ;;  %v1650_v58 = vmul.f32 1.442695, %v1635_v44 }
 0x114   : > { %2025 = vmatpush1.bf16.msra.mxu0 %v2024_v50  ;;  %v1654_v52 = vmul.f32 1.442695, %v1637_v22  ;;  %v1636_v1 = vsub.f32 0.0, %v1626_v47  ;;  %v2271_v57 = vpop.eup %2270  ;;  %v1638_v45 = vsub.f32 0.0, %v2848_v3  ;;  %v1658_v60 = vmul.f32 1.442695, %v1639_v42 }
 0x115   : > { %2286 = vpow2.f32 %v1644_v51  ;;  %v1648_v54 = vmul.f32 1.442695, %v1634_v18  ;;  %v2273_v31 = vpop.eup %2272  ;;  %v2026_v15 = vpack.c.bf16 %v2271_v57, %v2269_v23 }
 0x116   : > { %2288 = vpow2.f32 %v1650_v58  ;;  %v1652_v34 = vmul.f32 1.442695, %v1636_v1  ;;  %v2275_v8 = vpop.eup %2274  ;;  %v1656_v62 = vmul.f32 1.442695, %v1638_v45 }
 0x117   : > { %2290 = vpow2.f32 %v1654_v52  ;;  %v2277_v14 = vpop.eup %2276  ;;  %2027 = vmatprep.subr.bf16.mxu0 %v2026_v15  ;;  %v2028_v27 = vpack.c.bf16 %v2275_v8, %v2273_v31 }
 0x118   : > { %2292 = vpow2.f32 %v1648_v54 }
 0x119   : > { %2294 = vpow2.f32 %v1652_v34  ;;  %v2279_v21 = vpop.eup %2278  ;;  %2029 = vmatpush1.bf16.msra.mxu0 %v2028_v27 }
 0x11a   : > { %v2281_v56 = vpop.eup %2280  ;;  %1943 = vmatprep.subr.msk.mxu0 %vm294_vm0, %v2277_v14  ;;  %2296 = vpow2.f32 %v1658_v60 }
 0x11b   : > { %v2283_v48 = vpop.eup %2282  ;;  %v2030_v3 = vpack.c.bf16 %v2279_v21, %v2281_v56  ;;  %2298 = vpow2.f32 %v1656_v62 }
 0x11d   : > { %v2285_v49 = vpop.eup %2284  ;;  %1944 = vmatpush1.msk.msra.mxu0 %vm294_vm0, %v2283_v48 }
 0x11e   : > { %2031 = vmatprep.subr.bf16.mxu0 %v2030_v3  ;;  %1945 = vmatmul.mubr.msk.f32.vlgmr.msra.gmra.mrb[0].mxu0 %vm512_vm1, %v1942_v53 }
 0x11f   : > { %v2287_v6 = vpop.eup %2286  ;;  %1735 = vmatprep.mubr.f32.mxu0 %v2381_v33 }
 0x120   : > { %v2289_v13 = vpop.eup %2288  ;;  %v2032_v28 = vpack.c.bf16 %v2287_v6, %v2285_v49 }
 0x121   : > { %v2291_v39 = vpop.eup %2290 }
 0x122   : > { %v2293_v61 = vpop.eup %2292  ;;  %2033 = vmatpush1.bf16.msra.mxu0 %v2032_v28  ;;  %v2034_v19 = vpack.c.bf16 %v2291_v39, %v2289_v13 }
 0x123   : > { %v2295_v29 = vpop.eup %2294 }
 0x124   : > { %2035 = vmatprep.subr.bf16.mxu0 %v2034_v19  ;;  %v2036_v9 = vpack.c.bf16 %v2295_v29, %v2293_v61  ;;  %v2297_v43 = vpop.eup %2296 }
 0x125   : > { %v2299_v59 = vpop.eup %2298 }
 0x126   : > { %2037 = vmatpush1.bf16.msra.mxu0 %v2036_v9 }
 0x127   : > { %1957 = vmatprep.subr.msk.mxu0 %vm294_vm0, %v2297_v43 }
 0x12a   : > { %1958 = vmatpush1.msk.msra.mxu0 %vm294_vm0, %v2299_v59 }
 0x12b   : > { %1959 = vmatmul.mubr.msk.f32.vlgmr.msra.gmra.mrb[0].mxu0 %vm512_vm1, %v1956_v20 }
 0x1e2   : > { %v1017_v33 = vpop.f32.mrb[0].mxu1 }
 0x1e3   : > { %v1019_v24 = vpop.f32.mrb[1].mxu1  ;;  %v2038_v5 = vadd.f32 %v1017_v33, %v510_v0 }
 0x1e4   : > { %v2040_v16 = vadd.f32 %v1019_v24, %v510_v0 }
 0x1fe   : > { %v1737_v25 = vpop.f32.mrb[0].mxu0 }
 0x1ff   : > { %v2039_v12 = vadd.f32 %v2038_v5, %v1737_v25  ;;  %v1739_v4 = vpop.f32.mrb[1].mxu0 }
 0x200   : > { %v2041_v26 = vadd.f32 %v2040_v16, %v1739_v4 }
 0x201   : > { %1744 = vst [vmem:[%s269_s17] sm:$0xff] %v2039_v12 }
 0x202   : > { %1745 = vst [vmem:[%s269_s17 + $0x8] sm:$0xff] %v2041_v26 }
 0x203   : > { %2313 = shalt.err (!%p2310_p5)
}
 0x204   : > { %s2314_s12 = scalar_lea.hbm %s2899_s27, 256  ;;  %s2318_s15 = scalar_lea.hbm %s2952_s6, 512 }
 0x205   : > { %p2315_p6 = scmp.ne.s32.totalorder %s2899_s27, %s2314_s12  ;;  %p2319_p10 = scmp.lt.u32.totalorder %s2899_s27, %s2952_s6 }
 0x206   : > { %p2320_p11 = scmp.lt.u32.totalorder %s2318_s15, %s2314_s12  ;;  %p2322_p13 = scmp.lt.u32.totalorder %s2314_s12, %s2899_s27 }
 0x207   : > { %p2316_p7 = pnand %p2315_p6, %p2458_p4 }
 0x208   : > { %p2321_p12 = por %p2320_p11, %p2319_p10 }
 0x209   : > { %p2317_p9 = pneg %p2316_p7 }
 0x20a   : > { %p2323_p0 = por %p2322_p13, %p2321_p12 }
 0x20c   : > { %p2324_p1 = pnand %p2323_p0, %p2317_p9 }
 0x20e   : > { %2327 = shalt.err (!%p2324_p1)
}
 0x20f   : > { %2057 = dma.vmem_to_hbm [thread:$0]  (%p2458_p4), %s2901_s18, 256, %s2899_s27, %s1747_s24  }
 0x210 PF: > { %p2063_p2 = scmp.ge.s32.totalorder %s2378_s26, 2  ;;  %s1775_s19 = sand.u32 1, %s2358_s21  }
 0x211   : > { %s1776_s20 = scalar_lea.sflag [#allocation3], %s1775_s19 }
 0x212   : > { %p2060_p3 = pnand %p2063_p2, %p2465_p8 }
 0x214   : > { %2353 = dma.done.wait (!%p2060_p3), %s1776_s20, 256  }
 0x215   : > { %2355 = vsyncadd (!%p2060_p3), %s1776_s20, 4294967040  ;;  %s19_s26 = sadd.s32 1, %s2378_s26   ;;  %s2955_s21 = smov %s2362_s22 }
 0x216   : > { %p16_p5 = scmp.ge.s32.totalorder %s19_s26, 4   ;;  %s2956_s22 = smov %s2366_s23 }
 0x217   : > { %s2957_s23 = smov %s2471_s10  ;;  %s2958_s24 = smov %s2374_s25 }
 0x218   : > { %s2959_s25 = smov %s2961_s29  ;;  %18 = sbr.rel (!%p16_p5) target bundleno = 4 (0x4), region = 86 }
 0x21f   :  { %1781 = vsyncpa [#allocation3], 1 }
 0x220   :  { %1783 = vsyncpa [#allocation3 + $0x1], 1 }

</bundles_post_ra>
